<compile_context>
chip_gen: v7x
topology: tpu7x:2x2x1
jax: 0.10.0
libtpu: 0.0.40
codegen_flags: <defaults>
</compile_context>

<pallas_src>
import functools

import numpy as np

import jax
import jax.numpy as jnp
from jax.experimental import pallas as pl
from jax.experimental.pallas import tpu as pltpu

LANE = 128
CONV2_TAPS = 16  # 4x4 kernel


def _round_up(v, m):
    v, m = int(v), int(m)
    return (v + m - 1) // m * m


def _pad_to(a, shape):
    a = np.asarray(a, np.float32)
    pads = [(0, int(t) - int(s)) for s, t in zip(a.shape, shape)]
    return np.pad(a, pads)


def _conv_spatial(h, w):
    h, w = int(h), int(w)
    h1, w1 = (h - 8) // 4 + 1, (w - 8) // 4 + 1
    h2, w2 = (h1 - 4) // 2 + 1, (w1 - 4) // 2 + 1
    h3, w3 = h2 - 3 + 1, w2 - 3 + 1
    return (h1, w1), (h2, w2), (h3, w3)


def conv_out_size(input_shape):
    _, _, (h3, w3) = _conv_spatial(int(input_shape[1]), int(input_shape[2]))
    return 64 * int(h3) * int(w3)


# ----------------------------------------------------------------------------
# Fused forward kernel.  Everything (weights + activations) lives in VMEM.
#   conv1  : one matmul over all (tap, conv2-output-position, sample) patch rows
#   conv2  : 16 contiguous row-block copies -> one (m2, 16*C1) patch matrix
#            -> one matmul
#   conv3  : dense (n_pos*C2 -> C3) FC (its output is 1x1) after flattening the
#            n_pos position blocks of h2 along lanes
#   fc1/fc2: plain matmuls; fc2 N padded to 128 lanes, sliced in the wrapper.
# Weights are bf16, accumulation f32, bias+ReLU f32 (v5e has no bf16 VPU path).
# ----------------------------------------------------------------------------
def _fused_net_kernel(n_tap2, n_pos, batch,
                      p1_ref, w1_ref, b1_ref, w2_ref, b2_ref, w3_ref, b3_ref,
                      wf1_ref, bf1_ref, wf2_ref, bf2_ref, out_ref,
                      h1_ref, p2_ref, h2_ref, h2f_ref):
    dot = functools.partial(jnp.dot, preferred_element_type=jnp.float32)
    c1 = w1_ref.shape[1]            # conv1 out channels (32)
    c2 = w2_ref.shape[1]            # conv2 out channels (64)
    m2 = n_pos * batch              # conv2 output rows (position-major)

    # conv1: one MXU matmul, bias + ReLU in f32.
    h1_ref[...] = jnp.maximum(dot(p1_ref[...], w1_ref[...]) + b1_ref[...], 0.0)

    # conv2 im2col: the wrapper ordered conv1's patch rows so that rows
    # [t*m2, (t+1)*m2) are exactly the activations feeding conv2 kernel tap t
    # for every (output position, sample).  Lay the taps side by side along
    # lanes, then ONE conv2 matmul.
    for t in range(n_tap2):
        p2_ref[:, t * c1:(t + 1) * c1] = h1_ref[t * m2:(t + 1) * m2, :]
    h2_ref[...] = jnp.maximum(
        dot(p2_ref[...].astype(jnp.bfloat16), w2_ref[...]) + b2_ref[...], 0.0)

    # conv3 (3x3 -> 1x1) == dense (n_pos*c2 -> c3) linear layer: flatten the
    # n_pos position blocks of h2 along lanes, per sample, then one matmul.
    for p in range(n_pos):
        h2f_ref[:, p * c2:(p + 1) * c2] = h2_ref[p * batch:(p + 1) * batch, :]
    h3 = jnp.maximum(
        dot(h2f_ref[...].astype(jnp.bfloat16), w3_ref[...]) + b3_ref[...], 0.0)

    # fc1 + ReLU, fc2 (N padded to 128 lanes -> lane-dense output store).
    h4 = jnp.maximum(dot(h3.astype(jnp.bfloat16), wf1_ref[...]) + bf1_ref[...], 0.0)
    out_ref[...] = dot(h4.astype(jnp.bfloat16), wf2_ref[...]) + bf2_ref[...]


# ----------------------------------------------------------------------------
# Host-side helpers (numpy / XLA wrapper glue).
# ----------------------------------------------------------------------------
def _im2col_nhwc(x_nhwc, kh, kw, stride):
    """NHWC -> (N*OH*OW, KH*KW*C) patches, feature order (KH, KW, C)."""
    n, h, w, c = (int(s) for s in x_nhwc.shape)
    oh = (h - kh) // stride + 1
    ow = (w - kw) // stride + 1
    cols = []
    for i in range(kh):
        for j in range(kw):
            cols.append(jax.lax.slice(
                x_nhwc, (0, i, j, 0),
                (n, i + (oh - 1) * stride + 1, j + (ow - 1) * stride + 1, c),
                (1, stride, stride, 1)))
    p = jnp.stack(cols, axis=3)                    # (N, OH, OW, KH*KW, C)
    return p.reshape(n * oh * ow, kh * kw * c)


def _conv2_gather_index(ih, iw, oh, ow):
    """Flat conv1-output position (y*iw + x) feeding conv2 tap (i, j) at conv2
    output position (oy, ox); order is tap-major, position-minor."""
    ih, iw, oh, ow = int(ih), int(iw), int(oh), int(ow)
    idx = []
    for i in range(4):
        for j in range(4):
            for oy in range(oh):
                for ox in range(ow):
                    idx.append((2 * oy + i) * iw + (2 * ox + j))
    return np.asarray(idx, dtype=np.int32)


def make_params(key, in_channels, conv_out, n_actions):
    in_channels, conv_out, n_actions = int(in_channels), int(conv_out), int(n_actions)
    ks = jax.random.split(key, 10)
    s = 0.05
    return {
        "conv1_w": jax.random.normal(ks[0], (32, in_channels, 8, 8), jnp.float32) * s,
        "conv1_b": jax.random.normal(ks[1], (32,), jnp.float32) * s,
        "conv2_w": jax.random.normal(ks[2], (64, 32, 4, 4), jnp.float32) * s,
        "conv2_b": jax.random.normal(ks[3], (64,), jnp.float32) * s,
        "conv3_w": jax.random.normal(ks[4], (64, 64, 3, 3), jnp.float32) * s,
        "conv3_b": jax.random.normal(ks[5], (64,), jnp.float32) * s,
        # PyTorch Linear stores weight as (out_features, in_features)
        "fc1_w": jax.random.normal(ks[6], (512, conv_out), jnp.float32) * s,
        "fc1_b": jax.random.normal(ks[7], (512,), jnp.float32) * s,
        "fc2_w": jax.random.normal(ks[8], (n_actions, 512), jnp.float32) * s,
        "fc2_b": jax.random.normal(ks[9], (n_actions,), jnp.float32) * s,
    }


def prepare_params(params, input_shape, n_actions):
    """Pack weights into MXU-friendly bf16 matmul layouts (batch-independent).
    Only fc2's N is padded (to 128 lanes, with zero weights/bias so padded
    outputs are exact zeros and can be sliced off)."""
    c_in = int(input_shape[0])
    n_actions = int(n_actions)
    _, _, (h3, w3) = _conv_spatial(input_shape[1], input_shape[2])
    # TODO(synk): configs with conv3 output spatial != 1x1 need a per-position
    # conv3 im2col plus a column permutation of fc1_w (NCHW flatten order).
    assert h3 == 1 and w3 == 1, "this packing assumes a 1x1 conv3 output"

    C1, C2, F1 = 32, 64, 512
    NAp = _round_up(n_actions, LANE)

    w1 = np.asarray(params["conv1_w"], np.float32)           # (32, c_in, 8, 8)
    w1p = w1.transpose(2, 3, 1, 0).reshape(8 * 8 * c_in, C1)
    b1p = np.asarray(params["conv1_b"], np.float32)[None, :]

    w2 = np.asarray(params["conv2_w"], np.float32)           # (64, 32, 4, 4)
    w2p = w2.transpose(2, 3, 1, 0).reshape(4 * 4 * C1, C2)
    b2p = np.asarray(params["conv2_b"], np.float32)[None, :]

    w3 = np.asarray(params["conv3_w"], np.float32)           # (64, 64, 3, 3)
    w3p = w3.transpose(2, 3, 1, 0).reshape(3 * 3 * C2, 64)   # dense 576 -> 64
    b3p = np.asarray(params["conv3_b"], np.float32)[None, :]

    wf1p = np.asarray(params["fc1_w"], np.float32).T         # (64, 512)
    bf1p = np.asarray(params["fc1_b"], np.float32)[None, :]
    wf2p = _pad_to(np.asarray(params["fc2_w"], np.float32).T, (F1, NAp))
    bf2p = _pad_to(np.asarray(params["fc2_b"], np.float32)[None, :], (1, NAp))

    weights = (w1p, w2p, w3p, wf1p, wf2p)
    biases = (b1p, b2p, b3p, bf1p, bf2p)
    packed = []
    for w, b in zip(weights, biases):
        packed.append(jnp.asarray(w, jnp.bfloat16))   # weights in bf16
        packed.append(jnp.asarray(b, jnp.float32))    # biases stay f32
    return tuple(packed)


def net_forward(packed, x, *, n_actions):
    """x: (N, C, H, W) float32 -> Q-values (N, n_actions)."""
    batch = int(x.shape[0])
    n_actions = int(n_actions)
    (oh1, ow1), (oh2, ow2), (oh3, ow3) = _conv_spatial(x.shape[2], x.shape[3])
    assert oh3 == 1 and ow3 == 1, "this packing assumes a 1x1 conv3 output"
    n_pos = oh2 * ow2                       # conv2 output positions (9)
    c_feat = 8 * 8 * int(x.shape[1])        # conv1 patch features (256)
    m2 = n_pos * batch

    # conv1 im2col (XLA glue on the raw input only), then reorder/duplicate the
    # patch rows so that block t holds the conv1 positions feeding conv2 kernel
    # tap t for every (conv2 output position, sample):
    #   row index = (t * n_pos + pos) * batch + n
    x_nhwc = jnp.transpose(x, (0, 2, 3, 1))
    P = _im2col_nhwc(x_nhwc, 8, 8, 4).reshape(batch, oh1 * ow1, c_feat)
    idx = jnp.asarray(_conv2_gather_index(oh1, ow1, oh2, ow2))      # (16*n_pos,)
    P2 = jnp.take(P, idx, axis=1)                                   # (N, 16*n_pos, feat)
    patches1 = jnp.transpose(P2, (1, 0, 2)).reshape(CONV2_TAPS * m2, c_feat)
    patches1 = patches1.astype(jnp.bfloat16)

    c1 = int(packed[0].shape[1])    # 32
    c2 = int(packed[2].shape[1])    # 64
    na_pad = int(packed[8].shape[1])

    vmem = pl.BlockSpec(memory_space=pltpu.MemorySpace.VMEM)
    kernel = functools.partial(_fused_net_kernel, CONV2_TAPS, n_pos, batch)
    out = pl.pallas_call(
        kernel,
        out_shape=jax.ShapeDtypeStruct((batch, na_pad), jnp.float32),
        in_specs=[vmem] * (1 + len(packed)),
        out_specs=vmem,
        scratch_shapes=[
            pltpu.VMEM((CONV2_TAPS * m2, c1), jnp.float32),   # h1 (conv1 act)
            pltpu.VMEM((m2, CONV2_TAPS * c1), jnp.float32),   # conv2 patches
            pltpu.VMEM((m2, c2), jnp.float32),                # h2 (conv2 act)
            pltpu.VMEM((batch, n_pos * c2), jnp.float32),     # h2 flattened
        ],
    )(patches1, *packed)
    # TODO(synk): for larger batches add a batch grid axis with
    # dimension_semantics=("parallel",) (uses both v7x TensorCores) and prefetch
    # the ~0.35 MiB of bf16 weights across calls (cross-call semaphore pattern).
    return out[:, :n_actions]


# ----------------------------------------------------------------------------
# Plain-JAX f32 reference (no Pallas) for validation.
# ----------------------------------------------------------------------------
def reference_forward(params, x):
    hi = jax.lax.Precision.HIGHEST

    def conv_relu(h, w, b, stride):
        oc, ic, kh, kw = w.shape
        n = h.shape[0]
        h_nhwc = jnp.transpose(h, (0, 2, 3, 1))
        oh = (h_nhwc.shape[1] - kh) // stride + 1
        ow = (h_nhwc.shape[2] - kw) // stride + 1
        p = _im2col_nhwc(h_nhwc, kh, kw, stride)
        wm = jnp.transpose(w, (2, 3, 1, 0)).reshape(kh * kw * ic, oc)
        y = jnp.maximum(jnp.dot(p, wm, precision=hi) + b[None, :], 0.0)
        return jnp.transpose(y.reshape(n, oh, ow, oc), (0, 3, 1, 2))

    h = conv_relu(x, params["conv1_w"], params["conv1_b"], 4)
    h = conv_relu(h, params["conv2_w"], params["conv2_b"], 2)
    h = conv_relu(h, params["conv3_w"], params["conv3_b"], 1)
    h = h.reshape(x.shape[0], -1)
    h = jnp.maximum(jnp.dot(h, params["fc1_w"].T, precision=hi)
                    + params["fc1_b"], 0.0)
    return jnp.dot(h, params["fc2_w"].T, precision=hi) + params["fc2_b"]


if __name__ == "__main__":
    # 36x36 input -> conv1(8,s4): 8x8 -> conv2(4,s2): 3x3 -> conv3(3,s1): 1x1
    batch = 2
    input_shape = (4, 36, 36)
    n_actions = 6

    key = jax.random.PRNGKey(0)
    k_params, k_x = jax.random.split(key)
    params = make_params(k_params, input_shape[0], conv_out_size(input_shape),
                         n_actions)
    x = jax.random.normal(k_x, (batch, *input_shape), jnp.float32)

    packed = prepare_params(params, input_shape, n_actions)

    fwd = jax.jit(functools.partial(net_forward, n_actions=n_actions))
    q_values = fwd(packed, x)
    jax.block_until_ready(q_values)

    assert q_values.shape == (batch, n_actions), q_values.shape
    assert q_values.dtype == jnp.float32
    assert bool(jnp.all(jnp.isfinite(q_values)))

    ref = reference_forward(params, x)
    err = float(jnp.max(jnp.abs(q_values - ref)))
    tol = 5e-2 * (1.0 + float(jnp.max(jnp.abs(ref))))   # bf16 weights/activations
    assert err < tol, f"mismatch vs f32 reference: max|diff|={err} (tol={tol})"

    print("KERNEL_OK")
</pallas_src>

<mosaic_0001>
module attributes {stable_mosaic.version = 11 : i64} {
  func.func @_fused_net_kernel(%arg0: memref<288x256xbf16, #tpu.memory_space<vmem>>, %arg1: memref<256x32xbf16, #tpu.memory_space<vmem>>, %arg2: memref<1x32xf32, #tpu.memory_space<vmem>>, %arg3: memref<512x64xbf16, #tpu.memory_space<vmem>>, %arg4: memref<1x64xf32, #tpu.memory_space<vmem>>, %arg5: memref<576x64xbf16, #tpu.memory_space<vmem>>, %arg6: memref<1x64xf32, #tpu.memory_space<vmem>>, %arg7: memref<64x512xbf16, #tpu.memory_space<vmem>>, %arg8: memref<1x512xf32, #tpu.memory_space<vmem>>, %arg9: memref<512x128xbf16, #tpu.memory_space<vmem>>, %arg10: memref<1x128xf32, #tpu.memory_space<vmem>>, %arg11: memref<2x128xf32, #tpu.memory_space<vmem>>, %arg12: memref<288x32xf32, #tpu.memory_space<vmem>>, %arg13: memref<18x512xf32, #tpu.memory_space<vmem>>, %arg14: memref<18x64xf32, #tpu.memory_space<vmem>>, %arg15: memref<2x576xf32, #tpu.memory_space<vmem>>) attributes {dimension_semantics = [], scalar_prefetch = 0 : i64, scratch_operands = 4 : i64, tpu.core_type = #tpu.core_type<tc>} {
    %c0 = arith.constant 0 : index
    %c0_0 = arith.constant 0 : index
    %0 = vector.load %arg0[%c0, %c0_0] : memref<288x256xbf16, #tpu.memory_space<vmem>>, vector<288x256xbf16>
    %c0_1 = arith.constant 0 : index
    %c0_2 = arith.constant 0 : index
    %1 = vector.load %arg1[%c0_1, %c0_2] : memref<256x32xbf16, #tpu.memory_space<vmem>>, vector<256x32xbf16>
    %cst = arith.constant dense<0.000000e+00> : vector<288x32xf32>
    %2 = tpu.matmul %0, %1, %cst {dimension_numbers = #tpu.dot_dimension_numbers<[1], [0], [0], [1], [0, 0, 1, 1], [], []>} : vector<288x256xbf16>, vector<256x32xbf16>, vector<288x32xf32> -> vector<288x32xf32>
    %c0_3 = arith.constant 0 : index
    %c0_4 = arith.constant 0 : index
    %3 = vector.load %arg2[%c0_3, %c0_4] : memref<1x32xf32, #tpu.memory_space<vmem>>, vector<1x32xf32>
    %4 = vector.broadcast %3 : vector<1x32xf32> to vector<288x32xf32>
    %5 = arith.addf %2, %4 : vector<288x32xf32>
    %cst_5 = arith.constant 0.000000e+00 : f32
    %6 = vector.broadcast %cst_5 : f32 to vector<288x32xf32>
    %7 = arith.maximumf %5, %6 : vector<288x32xf32>
    %c0_6 = arith.constant 0 : index
    %c0_7 = arith.constant 0 : index
    %8 = vector.load %arg12[%c0_6, %c0_7] : memref<288x32xf32, #tpu.memory_space<vmem>>, vector<288x32xf32>
    tpu.vector_store %arg12[%c0_6, %c0_7], %7 {strides = array<i32>} : memref<288x32xf32, #tpu.memory_space<vmem>>, vector<288x32xf32>,
    %c0_8 = arith.constant 0 : index
    %c0_9 = arith.constant 0 : index
    %9 = vector.load %arg12[%c0_8, %c0_9] : memref<288x32xf32, #tpu.memory_space<vmem>>, vector<18x32xf32>
    %c0_10 = arith.constant 0 : index
    %c0_11 = arith.constant 0 : index
    %10 = vector.load %arg13[%c0_10, %c0_11] : memref<18x512xf32, #tpu.memory_space<vmem>>, vector<18x32xf32>
    tpu.vector_store %arg13[%c0_10, %c0_11], %9 {strides = array<i32>} : memref<18x512xf32, #tpu.memory_space<vmem>>, vector<18x32xf32>,
    %c18 = arith.constant 18 : index
    %c0_12 = arith.constant 0 : index
    %11 = vector.load %arg12[%c18, %c0_12] : memref<288x32xf32, #tpu.memory_space<vmem>>, vector<18x32xf32>
    %c0_13 = arith.constant 0 : index
    %c32 = arith.constant 32 : index
    %12 = vector.load %arg13[%c0_13, %c32] : memref<18x512xf32, #tpu.memory_space<vmem>>, vector<18x32xf32>
    tpu.vector_store %arg13[%c0_13, %c32], %11 {strides = array<i32>} : memref<18x512xf32, #tpu.memory_space<vmem>>, vector<18x32xf32>,
    %c36 = arith.constant 36 : index
    %c0_14 = arith.constant 0 : index
    %13 = vector.load %arg12[%c36, %c0_14] : memref<288x32xf32, #tpu.memory_space<vmem>>, vector<18x32xf32>
    %c0_15 = arith.constant 0 : index
    %c64 = arith.constant 64 : index
    %14 = vector.load %arg13[%c0_15, %c64] : memref<18x512xf32, #tpu.memory_space<vmem>>, vector<18x32xf32>
    tpu.vector_store %arg13[%c0_15, %c64], %13 {strides = array<i32>} : memref<18x512xf32, #tpu.memory_space<vmem>>, vector<18x32xf32>,
    %c54 = arith.constant 54 : index
    %c0_16 = arith.constant 0 : index
    %15 = vector.load %arg12[%c54, %c0_16] : memref<288x32xf32, #tpu.memory_space<vmem>>, vector<18x32xf32>
    %c0_17 = arith.constant 0 : index
    %c96 = arith.constant 96 : index
    %16 = vector.load %arg13[%c0_17, %c96] : memref<18x512xf32, #tpu.memory_space<vmem>>, vector<18x32xf32>
    tpu.vector_store %arg13[%c0_17, %c96], %15 {strides = array<i32>} : memref<18x512xf32, #tpu.memory_space<vmem>>, vector<18x32xf32>,
    %c72 = arith.constant 72 : index
    %c0_18 = arith.constant 0 : index
    %17 = vector.load %arg12[%c72, %c0_18] : memref<288x32xf32, #tpu.memory_space<vmem>>, vector<18x32xf32>
    %c0_19 = arith.constant 0 : index
    %c128 = arith.constant 128 : index
    %18 = vector.load %arg13[%c0_19, %c128] : memref<18x512xf32, #tpu.memory_space<vmem>>, vector<18x32xf32>
    tpu.vector_store %arg13[%c0_19, %c128], %17 {strides = array<i32>} : memref<18x512xf32, #tpu.memory_space<vmem>>, vector<18x32xf32>,
    %c90 = arith.constant 90 : index
    %c0_20 = arith.constant 0 : index
    %19 = vector.load %arg12[%c90, %c0_20] : memref<288x32xf32, #tpu.memory_space<vmem>>, vector<18x32xf32>
    %c0_21 = arith.constant 0 : index
    %c160 = arith.constant 160 : index
    %20 = vector.load %arg13[%c0_21, %c160] : memref<18x512xf32, #tpu.memory_space<vmem>>, vector<18x32xf32>
    tpu.vector_store %arg13[%c0_21, %c160], %19 {strides = array<i32>} : memref<18x512xf32, #tpu.memory_space<vmem>>, vector<18x32xf32>,
    %c108 = arith.constant 108 : index
    %c0_22 = arith.constant 0 : index
    %21 = vector.load %arg12[%c108, %c0_22] : memref<288x32xf32, #tpu.memory_space<vmem>>, vector<18x32xf32>
    %c0_23 = arith.constant 0 : index
    %c192 = arith.constant 192 : index
    %22 = vector.load %arg13[%c0_23, %c192] : memref<18x512xf32, #tpu.memory_space<vmem>>, vector<18x32xf32>
    tpu.vector_store %arg13[%c0_23, %c192], %21 {strides = array<i32>} : memref<18x512xf32, #tpu.memory_space<vmem>>, vector<18x32xf32>,
    %c126 = arith.constant 126 : index
    %c0_24 = arith.constant 0 : index
    %23 = vector.load %arg12[%c126, %c0_24] : memref<288x32xf32, #tpu.memory_space<vmem>>, vector<18x32xf32>
    %c0_25 = arith.constant 0 : index
    %c224 = arith.constant 224 : index
    %24 = vector.load %arg13[%c0_25, %c224] : memref<18x512xf32, #tpu.memory_space<vmem>>, vector<18x32xf32>
    tpu.vector_store %arg13[%c0_25, %c224], %23 {strides = array<i32>} : memref<18x512xf32, #tpu.memory_space<vmem>>, vector<18x32xf32>,
    %c144 = arith.constant 144 : index
    %c0_26 = arith.constant 0 : index
    %25 = vector.load %arg12[%c144, %c0_26] : memref<288x32xf32, #tpu.memory_space<vmem>>, vector<18x32xf32>
    %c0_27 = arith.constant 0 : index
    %c256 = arith.constant 256 : index
    %26 = vector.load %arg13[%c0_27, %c256] : memref<18x512xf32, #tpu.memory_space<vmem>>, vector<18x32xf32>
    tpu.vector_store %arg13[%c0_27, %c256], %25 {strides = array<i32>} : memref<18x512xf32, #tpu.memory_space<vmem>>, vector<18x32xf32>,
    %c162 = arith.constant 162 : index
    %c0_28 = arith.constant 0 : index
    %27 = vector.load %arg12[%c162, %c0_28] : memref<288x32xf32, #tpu.memory_space<vmem>>, vector<18x32xf32>
    %c0_29 = arith.constant 0 : index
    %c288 = arith.constant 288 : index
    %28 = vector.load %arg13[%c0_29, %c288] : memref<18x512xf32, #tpu.memory_space<vmem>>, vector<18x32xf32>
    tpu.vector_store %arg13[%c0_29, %c288], %27 {strides = array<i32>} : memref<18x512xf32, #tpu.memory_space<vmem>>, vector<18x32xf32>,
    %c180 = arith.constant 180 : index
    %c0_30 = arith.constant 0 : index
    %29 = vector.load %arg12[%c180, %c0_30] : memref<288x32xf32, #tpu.memory_space<vmem>>, vector<18x32xf32>
    %c0_31 = arith.constant 0 : index
    %c320 = arith.constant 320 : index
    %30 = vector.load %arg13[%c0_31, %c320] : memref<18x512xf32, #tpu.memory_space<vmem>>, vector<18x32xf32>
    tpu.vector_store %arg13[%c0_31, %c320], %29 {strides = array<i32>} : memref<18x512xf32, #tpu.memory_space<vmem>>, vector<18x32xf32>,
    %c198 = arith.constant 198 : index
    %c0_32 = arith.constant 0 : index
    %31 = vector.load %arg12[%c198, %c0_32] : memref<288x32xf32, #tpu.memory_space<vmem>>, vector<18x32xf32>
    %c0_33 = arith.constant 0 : index
    %c352 = arith.constant 352 : index
    %32 = vector.load %arg13[%c0_33, %c352] : memref<18x512xf32, #tpu.memory_space<vmem>>, vector<18x32xf32>
    tpu.vector_store %arg13[%c0_33, %c352], %31 {strides = array<i32>} : memref<18x512xf32, #tpu.memory_space<vmem>>, vector<18x32xf32>,
    %c216 = arith.constant 216 : index
    %c0_34 = arith.constant 0 : index
    %33 = vector.load %arg12[%c216, %c0_34] : memref<288x32xf32, #tpu.memory_space<vmem>>, vector<18x32xf32>
    %c0_35 = arith.constant 0 : index
    %c384 = arith.constant 384 : index
    %34 = vector.load %arg13[%c0_35, %c384] : memref<18x512xf32, #tpu.memory_space<vmem>>, vector<18x32xf32>
    tpu.vector_store %arg13[%c0_35, %c384], %33 {strides = array<i32>} : memref<18x512xf32, #tpu.memory_space<vmem>>, vector<18x32xf32>,
    %c234 = arith.constant 234 : index
    %c0_36 = arith.constant 0 : index
    %35 = vector.load %arg12[%c234, %c0_36] : memref<288x32xf32, #tpu.memory_space<vmem>>, vector<18x32xf32>
    %c0_37 = arith.constant 0 : index
    %c416 = arith.constant 416 : index
    %36 = vector.load %arg13[%c0_37, %c416] : memref<18x512xf32, #tpu.memory_space<vmem>>, vector<18x32xf32>
    tpu.vector_store %arg13[%c0_37, %c416], %35 {strides = array<i32>} : memref<18x512xf32, #tpu.memory_space<vmem>>, vector<18x32xf32>,
    %c252 = arith.constant 252 : index
    %c0_38 = arith.constant 0 : index
    %37 = vector.load %arg12[%c252, %c0_38] : memref<288x32xf32, #tpu.memory_space<vmem>>, vector<18x32xf32>
    %c0_39 = arith.constant 0 : index
    %c448 = arith.constant 448 : index
    %38 = vector.load %arg13[%c0_39, %c448] : memref<18x512xf32, #tpu.memory_space<vmem>>, vector<18x32xf32>
    tpu.vector_store %arg13[%c0_39, %c448], %37 {strides = array<i32>} : memref<18x512xf32, #tpu.memory_space<vmem>>, vector<18x32xf32>,
    %c270 = arith.constant 270 : index
    %c0_40 = arith.constant 0 : index
    %39 = vector.load %arg12[%c270, %c0_40] : memref<288x32xf32, #tpu.memory_space<vmem>>, vector<18x32xf32>
    %c0_41 = arith.constant 0 : index
    %c480 = arith.constant 480 : index
    %40 = vector.load %arg13[%c0_41, %c480] : memref<18x512xf32, #tpu.memory_space<vmem>>, vector<18x32xf32>
    tpu.vector_store %arg13[%c0_41, %c480], %39 {strides = array<i32>} : memref<18x512xf32, #tpu.memory_space<vmem>>, vector<18x32xf32>,
    %c0_42 = arith.constant 0 : index
    %c0_43 = arith.constant 0 : index
    %41 = vector.load %arg13[%c0_42, %c0_43] : memref<18x512xf32, #tpu.memory_space<vmem>>, vector<18x512xf32>
    %42 = arith.truncf %41 : vector<18x512xf32> to vector<18x512xbf16>
    %c0_44 = arith.constant 0 : index
    %c0_45 = arith.constant 0 : index
    %43 = vector.load %arg3[%c0_44, %c0_45] : memref<512x64xbf16, #tpu.memory_space<vmem>>, vector<512x64xbf16>
    %cst_46 = arith.constant dense<0.000000e+00> : vector<18x64xf32>
    %44 = tpu.matmul %42, %43, %cst_46 {dimension_numbers = #tpu.dot_dimension_numbers<[1], [0], [0], [1], [0, 0, 1, 1], [], []>} : vector<18x512xbf16>, vector<512x64xbf16>, vector<18x64xf32> -> vector<18x64xf32>
    %c0_47 = arith.constant 0 : index
    %c0_48 = arith.constant 0 : index
    %45 = vector.load %arg4[%c0_47, %c0_48] : memref<1x64xf32, #tpu.memory_space<vmem>>, vector<1x64xf32>
    %46 = vector.broadcast %45 : vector<1x64xf32> to vector<18x64xf32>
    %47 = arith.addf %44, %46 : vector<18x64xf32>
    %cst_49 = arith.constant 0.000000e+00 : f32
    %48 = vector.broadcast %cst_49 : f32 to vector<18x64xf32>
    %49 = arith.maximumf %47, %48 : vector<18x64xf32>
    %c0_50 = arith.constant 0 : index
    %c0_51 = arith.constant 0 : index
    %50 = vector.load %arg14[%c0_50, %c0_51] : memref<18x64xf32, #tpu.memory_space<vmem>>, vector<18x64xf32>
    tpu.vector_store %arg14[%c0_50, %c0_51], %49 {strides = array<i32>} : memref<18x64xf32, #tpu.memory_space<vmem>>, vector<18x64xf32>,
    %c0_52 = arith.constant 0 : index
    %c0_53 = arith.constant 0 : index
    %51 = vector.load %arg14[%c0_52, %c0_53] : memref<18x64xf32, #tpu.memory_space<vmem>>, vector<2x64xf32>
    %c0_54 = arith.constant 0 : index
    %c0_55 = arith.constant 0 : index
    %52 = vector.load %arg15[%c0_54, %c0_55] : memref<2x576xf32, #tpu.memory_space<vmem>>, vector<2x64xf32>
    tpu.vector_store %arg15[%c0_54, %c0_55], %51 {strides = array<i32>} : memref<2x576xf32, #tpu.memory_space<vmem>>, vector<2x64xf32>,
    %c2 = arith.constant 2 : index
    %c0_56 = arith.constant 0 : index
    %53 = vector.load %arg14[%c2, %c0_56] : memref<18x64xf32, #tpu.memory_space<vmem>>, vector<2x64xf32>
    %c0_57 = arith.constant 0 : index
    %c64_58 = arith.constant 64 : index
    %54 = vector.load %arg15[%c0_57, %c64_58] : memref<2x576xf32, #tpu.memory_space<vmem>>, vector<2x64xf32>
    tpu.vector_store %arg15[%c0_57, %c64_58], %53 {strides = array<i32>} : memref<2x576xf32, #tpu.memory_space<vmem>>, vector<2x64xf32>,
    %c4 = arith.constant 4 : index
    %c0_59 = arith.constant 0 : index
    %55 = vector.load %arg14[%c4, %c0_59] : memref<18x64xf32, #tpu.memory_space<vmem>>, vector<2x64xf32>
    %c0_60 = arith.constant 0 : index
    %c128_61 = arith.constant 128 : index
    %56 = vector.load %arg15[%c0_60, %c128_61] : memref<2x576xf32, #tpu.memory_space<vmem>>, vector<2x64xf32>
    tpu.vector_store %arg15[%c0_60, %c128_61], %55 {strides = array<i32>} : memref<2x576xf32, #tpu.memory_space<vmem>>, vector<2x64xf32>,
    %c6 = arith.constant 6 : index
    %c0_62 = arith.constant 0 : index
    %57 = vector.load %arg14[%c6, %c0_62] : memref<18x64xf32, #tpu.memory_space<vmem>>, vector<2x64xf32>
    %c0_63 = arith.constant 0 : index
    %c192_64 = arith.constant 192 : index
    %58 = vector.load %arg15[%c0_63, %c192_64] : memref<2x576xf32, #tpu.memory_space<vmem>>, vector<2x64xf32>
    tpu.vector_store %arg15[%c0_63, %c192_64], %57 {strides = array<i32>} : memref<2x576xf32, #tpu.memory_space<vmem>>, vector<2x64xf32>,
    %c8 = arith.constant 8 : index
    %c0_65 = arith.constant 0 : index
    %59 = vector.load %arg14[%c8, %c0_65] : memref<18x64xf32, #tpu.memory_space<vmem>>, vector<2x64xf32>
    %c0_66 = arith.constant 0 : index
    %c256_67 = arith.constant 256 : index
    %60 = vector.load %arg15[%c0_66, %c256_67] : memref<2x576xf32, #tpu.memory_space<vmem>>, vector<2x64xf32>
    tpu.vector_store %arg15[%c0_66, %c256_67], %59 {strides = array<i32>} : memref<2x576xf32, #tpu.memory_space<vmem>>, vector<2x64xf32>,
    %c10 = arith.constant 10 : index
    %c0_68 = arith.constant 0 : index
    %61 = vector.load %arg14[%c10, %c0_68] : memref<18x64xf32, #tpu.memory_space<vmem>>, vector<2x64xf32>
    %c0_69 = arith.constant 0 : index
    %c320_70 = arith.constant 320 : index
    %62 = vector.load %arg15[%c0_69, %c320_70] : memref<2x576xf32, #tpu.memory_space<vmem>>, vector<2x64xf32>
    tpu.vector_store %arg15[%c0_69, %c320_70], %61 {strides = array<i32>} : memref<2x576xf32, #tpu.memory_space<vmem>>, vector<2x64xf32>,
    %c12 = arith.constant 12 : index
    %c0_71 = arith.constant 0 : index
    %63 = vector.load %arg14[%c12, %c0_71] : memref<18x64xf32, #tpu.memory_space<vmem>>, vector<2x64xf32>
    %c0_72 = arith.constant 0 : index
    %c384_73 = arith.constant 384 : index
    %64 = vector.load %arg15[%c0_72, %c384_73] : memref<2x576xf32, #tpu.memory_space<vmem>>, vector<2x64xf32>
    tpu.vector_store %arg15[%c0_72, %c384_73], %63 {strides = array<i32>} : memref<2x576xf32, #tpu.memory_space<vmem>>, vector<2x64xf32>,
    %c14 = arith.constant 14 : index
    %c0_74 = arith.constant 0 : index
    %65 = vector.load %arg14[%c14, %c0_74] : memref<18x64xf32, #tpu.memory_space<vmem>>, vector<2x64xf32>
    %c0_75 = arith.constant 0 : index
    %c448_76 = arith.constant 448 : index
    %66 = vector.load %arg15[%c0_75, %c448_76] : memref<2x576xf32, #tpu.memory_space<vmem>>, vector<2x64xf32>
    tpu.vector_store %arg15[%c0_75, %c448_76], %65 {strides = array<i32>} : memref<2x576xf32, #tpu.memory_space<vmem>>, vector<2x64xf32>,
    %c16 = arith.constant 16 : index
    %c0_77 = arith.constant 0 : index
    %67 = vector.load %arg14[%c16, %c0_77] : memref<18x64xf32, #tpu.memory_space<vmem>>, vector<2x64xf32>
    %c0_78 = arith.constant 0 : index
    %c512 = arith.constant 512 : index
    %68 = vector.load %arg15[%c0_78, %c512] : memref<2x576xf32, #tpu.memory_space<vmem>>, vector<2x64xf32>
    tpu.vector_store %arg15[%c0_78, %c512], %67 {strides = array<i32>} : memref<2x576xf32, #tpu.memory_space<vmem>>, vector<2x64xf32>,
    %c0_79 = arith.constant 0 : index
    %c0_80 = arith.constant 0 : index
    %69 = vector.load %arg15[%c0_79, %c0_80] : memref<2x576xf32, #tpu.memory_space<vmem>>, vector<2x576xf32>
    %70 = arith.truncf %69 : vector<2x576xf32> to vector<2x576xbf16>
    %c0_81 = arith.constant 0 : index
    %c0_82 = arith.constant 0 : index
    %71 = vector.load %arg5[%c0_81, %c0_82] : memref<576x64xbf16, #tpu.memory_space<vmem>>, vector<576x64xbf16>
    %cst_83 = arith.constant dense<0.000000e+00> : vector<2x64xf32>
    %72 = tpu.matmul %70, %71, %cst_83 {dimension_numbers = #tpu.dot_dimension_numbers<[1], [0], [0], [1], [0, 0, 1, 1], [], []>} : vector<2x576xbf16>, vector<576x64xbf16>, vector<2x64xf32> -> vector<2x64xf32>
    %c0_84 = arith.constant 0 : index
    %c0_85 = arith.constant 0 : index
    %73 = vector.load %arg6[%c0_84, %c0_85] : memref<1x64xf32, #tpu.memory_space<vmem>>, vector<1x64xf32>
    %74 = vector.broadcast %73 : vector<1x64xf32> to vector<2x64xf32>
    %75 = arith.addf %72, %74 : vector<2x64xf32>
    %cst_86 = arith.constant 0.000000e+00 : f32
    %76 = vector.broadcast %cst_86 : f32 to vector<2x64xf32>
    %77 = arith.maximumf %75, %76 : vector<2x64xf32>
    %78 = arith.truncf %77 : vector<2x64xf32> to vector<2x64xbf16>
    %c0_87 = arith.constant 0 : index
    %c0_88 = arith.constant 0 : index
    %79 = vector.load %arg7[%c0_87, %c0_88] : memref<64x512xbf16, #tpu.memory_space<vmem>>, vector<64x512xbf16>
    %cst_89 = arith.constant dense<0.000000e+00> : vector<2x512xf32>
    %80 = tpu.matmul %78, %79, %cst_89 {dimension_numbers = #tpu.dot_dimension_numbers<[1], [0], [0], [1], [0, 0, 1, 1], [], []>} : vector<2x64xbf16>, vector<64x512xbf16>, vector<2x512xf32> -> vector<2x512xf32>
    %c0_90 = arith.constant 0 : index
    %c0_91 = arith.constant 0 : index
    %81 = vector.load %arg8[%c0_90, %c0_91] : memref<1x512xf32, #tpu.memory_space<vmem>>, vector<1x512xf32>
    %82 = vector.broadcast %81 : vector<1x512xf32> to vector<2x512xf32>
    %83 = arith.addf %80, %82 : vector<2x512xf32>
    %cst_92 = arith.constant 0.000000e+00 : f32
    %84 = vector.broadcast %cst_92 : f32 to vector<2x512xf32>
    %85 = arith.maximumf %83, %84 : vector<2x512xf32>
    %86 = arith.truncf %85 : vector<2x512xf32> to vector<2x512xbf16>
    %c0_93 = arith.constant 0 : index
    %c0_94 = arith.constant 0 : index
    %87 = vector.load %arg9[%c0_93, %c0_94] : memref<512x128xbf16, #tpu.memory_space<vmem>>, vector<512x128xbf16>
    %cst_95 = arith.constant dense<0.000000e+00> : vector<2x128xf32>
    %88 = tpu.matmul %86, %87, %cst_95 {dimension_numbers = #tpu.dot_dimension_numbers<[1], [0], [0], [1], [0, 0, 1, 1], [], []>} : vector<2x512xbf16>, vector<512x128xbf16>, vector<2x128xf32> -> vector<2x128xf32>
    %c0_96 = arith.constant 0 : index
    %c0_97 = arith.constant 0 : index
    %89 = vector.load %arg10[%c0_96, %c0_97] : memref<1x128xf32, #tpu.memory_space<vmem>>, vector<1x128xf32>
    %90 = vector.broadcast %89 : vector<1x128xf32> to vector<2x128xf32>
    %91 = arith.addf %88, %90 : vector<2x128xf32>
    %c0_98 = arith.constant 0 : index
    %c0_99 = arith.constant 0 : index
    %92 = vector.load %arg11[%c0_98, %c0_99] : memref<2x128xf32, #tpu.memory_space<vmem>>, vector<2x128xf32>
    tpu.vector_store %arg11[%c0_98, %c0_99], %91 {strides = array<i32>} : memref<2x128xf32, #tpu.memory_space<vmem>>, vector<2x128xf32>,
    return
  }
}

</mosaic_0001>

<bundles_post_ra>
// kernel: net_forward.1
= control target key start
LH: loop header
LB: loop body
LE: loop exit
PB: predicated region body
PF: predicated region fallthrough
CT: control target
= control target key end

     0   :  { %v2933_v1 = vmov 0   ;;  %s3730_s0 = inlined_call_operand.vmem [shape: bf16[288,256], index: 0, kind: input, shape index: {}]   ;;  %s3731_s1 = inlined_call_operand.vmem [shape: bf16[256,32], index: 1, kind: input, shape index: {}]   ;;  %s3732_s2 = inlined_call_operand.vmem [shape: f32[1,32], index: 2, kind: input, shape index: {}]   ;;  %s3733_s3 = inlined_call_operand.vmem [shape: bf16[512,64], index: 3, kind: input, shape index: {}]   ;;  %s3734_s4 = inlined_call_operand.vmem [shape: f32[1,64], index: 4, kind: input, shape index: {}]   ;;  %s3735_s5 = inlined_call_operand.vmem [shape: bf16[576,64], index: 5, kind: input, shape index: {}]   ;;  %s3736_s6 = inlined_call_operand.vmem [shape: f32[1,64], index: 6, kind: input, shape index: {}]   ;;  %s3737_s7 = inlined_call_operand.vmem [shape: bf16[64,512], index: 7, kind: input, shape index: {}]   ;;  %s3738_s8 = inlined_call_operand.vmem [shape: f32[1,512], index: 8, kind: input, shape index: {}]   ;;  %s3739_s9 = inlined_call_operand.vmem [shape: bf16[512,128], index: 9, kind: input, shape index: {}]   ;;  %s3740_s10 = inlined_call_operand.vmem [shape: f32[1,128], index: 10, kind: input, shape index: {}]   ;;  %s3741_s11 = inlined_call_operand.hbm [shape: f32[2,128], index: 11, kind: output, shape index: {}]  }
   0x1   :  { %v2714_v0 = vld [vmem:[%s3731_s1] sm:$0xff]   ;;  %391 = vmatprep.subr.bf16.mxu0 %v2933_v1  ;;  %v2715_v2 = vld [vmem:[%s3731_s1 + $0x8] sm:$0xff]   ;;  %v2716_v3 = vld [vmem:[%s3731_s1 + $0x10] sm:$0xff]  }
   0x2   :  { %392 = vmatpush1.bf16.msra.mxu0 %v2714_v0  ;;  %v2717_v4 = vld [vmem:[%s3731_s1 + $0x18] sm:$0xff]   ;;  %v2718_v5 = vld [vmem:[%s3731_s1 + $0x20] sm:$0xff]   ;;  %v2719_v7 = vld [vmem:[%s3731_s1 + $0x28] sm:$0xff]  }
   0x3   :  { %393 = vmatprep.subr.bf16.mxu0 %v2933_v1  ;;  %v2732_v6 = vld [vmem:[%s3730_s0 + $0x4] ss:$8 sps:$4 sm:$0xff]   ;;  %v2720_v8 = vld [vmem:[%s3731_s1 + $0x30] sm:$0xff]   ;;  %v2721_v9 = vld [vmem:[%s3731_s1 + $0x38] sm:$0xff]  }
   0x4   :  { %423 = vmatprep.mubr.bf16.mxu0 %v2732_v6  ;;  %v2722_v10 = vld [vmem:[%s3731_s1 + $0x40] sm:$0xff]   ;;  %v2723_v11 = vld [vmem:[%s3731_s1 + $0x48] sm:$0xff]   ;;  %v2724_v12 = vld [vmem:[%s3731_s1 + $0x50] sm:$0xff]  }
   0x5   :  { %v2725_v13 = vld [vmem:[%s3731_s1 + $0x58] sm:$0xff]   ;;  %v2726_v14 = vld [vmem:[%s3731_s1 + $0x60] sm:$0xff]   ;;  %v2727_v15 = vld [vmem:[%s3731_s1 + $0x68] sm:$0xff]  }
   0x6   :  { %394 = vmatpush1.bf16.msra.mxu0 %v2715_v2  ;;  %v2728_v16 = vld [vmem:[%s3731_s1 + $0x70] sm:$0xff]   ;;  %v2729_v17 = vld [vmem:[%s3731_s1 + $0x78] sm:$0xff]   ;;  %v2730_v18 = vld [vmem:[%s3730_s0] ss:$8 sps:$4 sm:$0xff]  }
   0x7   :  { %395 = vmatprep.subr.bf16.mxu0 %v2933_v1  ;;  %v2733_v19 = vld [vmem:[%s3730_s0 + $0x14] ss:$8 sps:$4 sm:$0xff]   ;;  %v2735_v20 = vld [vmem:[%s3730_s0 + $0x10] ss:$8 sps:$4 sm:$0xff]   ;;  %v2736_v21 = vld [vmem:[%s3730_s0 + $0x24] ss:$8 sps:$4 sm:$0xff]  }
   0x8   :  { %v2738_v22 = vld [vmem:[%s3730_s0 + $0x20] ss:$8 sps:$4 sm:$0xff]   ;;  %v2739_v23 = vld [vmem:[%s3730_s0 + $0x34] ss:$8 sps:$4 sm:$0xff]   ;;  %v2741_v24 = vld [vmem:[%s3730_s0 + $0x30] ss:$8 sps:$4 sm:$0xff]  }
   0x9   :  { %v2742_v25 = vld [vmem:[%s3730_s0 + $0x44] ss:$8 sps:$4 sm:$0xff]   ;;  %v2744_v26 = vld [vmem:[%s3730_s0 + $0x40] ss:$8 sps:$4 sm:$0xff]   ;;  %v2745_v27 = vld [vmem:[%s3730_s0 + $0x54] ss:$8 sps:$4 sm:$0xff]  }
   0xa   :  { %396 = vmatpush1.bf16.msra.mxu0 %v2716_v3  ;;  %v2747_v28 = vld [vmem:[%s3730_s0 + $0x50] ss:$8 sps:$4 sm:$0xff]   ;;  %v2748_v29 = vld [vmem:[%s3730_s0 + $0x64] ss:$8 sps:$4 sm:$0xff]   ;;  %v2750_v30 = vld [vmem:[%s3730_s0 + $0x60] ss:$8 sps:$4 sm:$0xff]  }
   0xb   :  { %397 = vmatprep.subr.bf16.mxu0 %v2933_v1  ;;  %v2751_v31 = vld [vmem:[%s3730_s0 + $0x74] ss:$8 sps:$4 sm:$0xff]  }
   0xe   :  { %398 = vmatpush1.bf16.msra.mxu0 %v2717_v4 }
   0xf   :  { %399 = vmatprep.subr.bf16.mxu0 %v2933_v1 }
  0x12   :  { %400 = vmatpush1.bf16.msra.mxu0 %v2718_v5 }
  0x13   :  { %401 = vmatprep.subr.bf16.mxu0 %v2933_v1 }
  0x16   :  { %402 = vmatpush1.bf16.msra.mxu0 %v2719_v7 }
  0x17   :  { %403 = vmatprep.subr.bf16.mxu0 %v2933_v1 }
  0x1a   :  { %404 = vmatpush1.bf16.msra.mxu0 %v2720_v8 }
  0x1b   :  { %405 = vmatprep.subr.bf16.mxu0 %v2933_v1 }
  0x1e   :  { %406 = vmatpush1.bf16.msra.mxu0 %v2721_v9 }
  0x1f   :  { %407 = vmatprep.subr.bf16.mxu0 %v2933_v1 }
  0x22   :  { %408 = vmatpush1.bf16.msra.mxu0 %v2722_v10 }
  0x23   :  { %409 = vmatprep.subr.bf16.mxu0 %v2933_v1 }
  0x26   :  { %410 = vmatpush1.bf16.msra.mxu0 %v2723_v11 }
  0x27   :  { %411 = vmatprep.subr.bf16.mxu0 %v2933_v1 }
  0x2a   :  { %412 = vmatpush1.bf16.msra.mxu0 %v2724_v12 }
  0x2b   :  { %413 = vmatprep.subr.bf16.mxu0 %v2933_v1 }
  0x2e   :  { %414 = vmatpush1.bf16.msra.mxu0 %v2725_v13 }
  0x2f   :  { %415 = vmatprep.subr.bf16.mxu0 %v2933_v1 }
  0x32   :  { %416 = vmatpush1.bf16.msra.mxu0 %v2726_v14 }
  0x33   :  { %417 = vmatprep.subr.bf16.mxu0 %v2933_v1 }
  0x36   :  { %418 = vmatpush1.bf16.msra.mxu0 %v2727_v15 }
  0x37   :  { %419 = vmatprep.subr.bf16.mxu0 %v2933_v1 }
  0x3a   :  { %420 = vmatpush1.bf16.msra.mxu0 %v2728_v16 }
  0x3b   :  { %421 = vmatprep.subr.bf16.mxu0 %v2933_v1 }
  0x3e   :  { %422 = vmatpush1.bf16.msra.mxu0 %v2729_v17 }
  0x41   :  { %424 = vmatmul.mubr.bf16.vlgmr.msra.gmra.mrb[0].mxu0 %v2730_v18 }
  0x42   :  { %431 = vmatprep.mubr.bf16.mxu0 %v2733_v19 }
  0x49   :  { %432 = vmatmul.mubr.bf16.gmra.mrb[4].mxu0 %v2735_v20 }
  0x4a   :  { %439 = vmatprep.mubr.bf16.mxu0 %v2736_v21 }
  0x51   :  { %440 = vmatmul.mubr.bf16.gmra.mrb[8].mxu0 %v2738_v22 }
  0x52   :  { %447 = vmatprep.mubr.bf16.mxu0 %v2739_v23 }
  0x59   :  { %448 = vmatmul.mubr.bf16.gmra.mrb[12].mxu0 %v2741_v24 }
  0x5a   :  { %455 = vmatprep.mubr.bf16.mxu0 %v2742_v25 }
  0x61   :  { %456 = vmatmul.mubr.bf16.gmra.mrb[16].mxu0 %v2744_v26 }
  0x62   :  { %463 = vmatprep.mubr.bf16.mxu0 %v2745_v27 }
  0x69   :  { %464 = vmatmul.mubr.bf16.gmra.mrb[20].mxu0 %v2747_v28 }
  0x6a   :  { %471 = vmatprep.mubr.bf16.mxu0 %v2748_v29 }
  0x6b   :  { %16 = vsyncpa [#allocation7], 0  ;;  %v2753_v32 = vld [vmem:[%s3730_s0 + $0x70] ss:$8 sps:$4 sm:$0xff]   ;;  %v2754_v33 = vld [vmem:[%s3730_s0 + $0x84] ss:$8 sps:$4 sm:$0xff]  }
  0x6c   :  { %v2756_v34 = vld [vmem:[%s3730_s0 + $0x80] ss:$8 sps:$4 sm:$0xff]   ;;  %v2757_v35 = vld [vmem:[%s3730_s0 + $0x94] ss:$8 sps:$4 sm:$0xff]   ;;  %v2759_v36 = vld [vmem:[%s3730_s0 + $0x90] ss:$8 sps:$4 sm:$0xff]  }
  0x6d   :  { %v2760_v37 = vld [vmem:[%s3730_s0 + $0xa4] ss:$8 sps:$4 sm:$0xff]   ;;  %v2762_v38 = vld [vmem:[%s3730_s0 + $0xa0] ss:$8 sps:$4 sm:$0xff]   ;;  %v2763_v39 = vld [vmem:[%s3730_s0 + $0xb4] ss:$8 sps:$4 sm:$0xff]  }
  0x6e   :  { %v2765_v40 = vld [vmem:[%s3730_s0 + $0xb0] ss:$8 sps:$4 sm:$0xff]   ;;  %v2766_v41 = vld [vmem:[%s3730_s0 + $0xc4] ss:$8 sps:$4 sm:$0xff]   ;;  %v2768_v42 = vld [vmem:[%s3730_s0 + $0xc0] ss:$8 sps:$4 sm:$0xff]  }
  0x6f   :  { %v2769_v43 = vld [vmem:[%s3730_s0 + $0xd4] ss:$8 sps:$4 sm:$0xff]   ;;  %v2771_v44 = vld [vmem:[%s3730_s0 + $0xd0] ss:$8 sps:$4 sm:$0xff]   ;;  %v2772_v45 = vld [vmem:[%s3730_s0 + $0xe4] ss:$8 sps:$4 sm:$0xff]  }
  0x70   :  { %v2774_v46 = vld [vmem:[%s3730_s0 + $0xe0] ss:$8 sps:$4 sm:$0xff]   ;;  %v2775_v47 = vld [vmem:[%s3730_s0 + $0xf4] ss:$8 sps:$4 sm:$0xff]   ;;  %v2777_v48 = vld [vmem:[%s3730_s0 + $0xf0] ss:$8 sps:$4 sm:$0xff]  }
  0x71   :  { %472 = vmatmul.mubr.bf16.gmra.mrb[24].mxu0 %v2750_v30  ;;  %v2778_v49 = vld [vmem:[%s3730_s0 + $0x104] ss:$8 sps:$4 sm:$0xff]   ;;  %v2780_v50 = vld [vmem:[%s3730_s0 + $0x100] ss:$8 sps:$4 sm:$0xff]   ;;  %v2781_v51 = vld [vmem:[%s3730_s0 + $0x114] ss:$8 sps:$4 sm:$0xff]  }
  0x72   :  { %479 = vmatprep.mubr.bf16.mxu0 %v2751_v31  ;;  %v2783_v52 = vld [vmem:[%s3730_s0 + $0x110] ss:$8 sps:$4 sm:$0xff]   ;;  %v3176_v53 = vld [vmem:[%s3732_s2] ss:$0 sm:$0xff]  ;;  %vm604_vm0 = vcmask 261120   ;;  %vm646_vm1 = vcmask 254976  }
  0x73   :  { %s2934_s0 = smov 32   ;;  %s2935_s2 = smov 64   ;;  %vm663_vm2 = vcmask 523520   ;;  %vm683_vm3 = vcmask 785920   ;;  %vm666_vm4 = vcmask 517376   ;;  %vm703_vm5 = vcmask 1048320  }
  0x74   :  { %s2936_s24 = smov 96   ;;  %vm686_vm6 = vcmask 779776   ;;  %vm706_vm7 = vcmask 1042176   ;;  %vm1270_vm8 = vcmask 523264   ;;  %vm1273_vm9 = vcmask 517120  }
  0x75   :  { %vm1289_vm10 = vcmask 1041920   ;;  %vm2939_vm11 = vmmov 0  }
  0x79   :  { %480 = vmatmul.mubr.bf16.gmra.mrb[28].mxu0 %v2753_v32 }
  0x7a   :  { %487 = vmatprep.mubr.bf16.mxu0 %v2754_v33 }
  0x81   :  { %488 = vmatmul.mubr.bf16.gmra.mrb[32].mxu0 %v2756_v34 }
  0x82   :  { %495 = vmatprep.mubr.bf16.mxu0 %v2757_v35 }
  0x89   :  { %496 = vmatmul.mubr.bf16.gmra.mrb[36].mxu0 %v2759_v36 }
  0x8a   :  { %503 = vmatprep.mubr.bf16.mxu0 %v2760_v37 }
  0x91   :  { %504 = vmatmul.mubr.bf16.gmra.mrb[40].mxu0 %v2762_v38 }
  0x92   :  { %511 = vmatprep.mubr.bf16.mxu0 %v2763_v39 }
  0x99   :  { %512 = vmatmul.mubr.bf16.gmra.mrb[44].mxu0 %v2765_v40  ;;  %v2784_v40 = vld [vmem:[%s3733_s3 + $0x40] sm:$0xff]  }
  0x9a   :  { %519 = vmatprep.mubr.bf16.mxu0 %v2766_v41  ;;  %v2785_v41 = vld [vmem:[%s3733_s3] sm:$0xff]   ;;  %2545 = vmatprep.subr.bf16.mxu1 %v2784_v40 }
  0x9b   :  { %2546 = vmatpush3.bf16.msra.mxu1 %v2785_v41 }
  0xa1   :  { %520 = vmatmul.mubr.bf16.gmra.mrb[48].mxu0 %v2768_v42 }
  0xa2   :  { %527 = vmatprep.mubr.bf16.mxu0 %v2769_v43 }
  0xa9   :  { %528 = vmatmul.mubr.bf16.gmra.mrb[52].mxu0 %v2771_v44 }
  0xaa   :  { %535 = vmatprep.mubr.bf16.mxu0 %v2772_v45 }
  0xb1   :  { %536 = vmatmul.mubr.bf16.gmra.mrb[56].mxu0 %v2774_v46 }
  0xb2   :  { %543 = vmatprep.mubr.bf16.mxu0 %v2775_v47 }
  0xb9   :  { %544 = vmatmul.mubr.bf16.gmra.mrb[60].mxu0 %v2777_v48 }
  0xba   :  { %551 = vmatprep.mubr.bf16.mxu0 %v2778_v49 }
  0xc1   :  { %552 = vmatmul.mubr.bf16.gmra.mrb[64].mxu0 %v2780_v50 }
  0xc2   :  { %559 = vmatprep.mubr.bf16.mxu0 %v2781_v51 }
  0xc9   :  { %560 = vmatmul.mubr.bf16.gmra.mrb[68].mxu0 %v2783_v52  ;;  %v2786_v52 = vld [vmem:[%s3733_s3 + $0x48] sm:$0xff]  }
  0xca   :  { %2547 = vmatprep.subr.bf16.mxu1 %v2786_v52 }
 0x114   :  { %v425_v54 = vpop.f32.mrb[0].mxu0 }
 0x115   :  { %v426_v55 = vadd.f32 %v3176_v53, %v425_v54  ;;  %v427_v56 = vpop.f32.mrb[1].mxu0 }
 0x116   :  { %v428_v57 = vpop.f32.mrb[2].mxu0 }
 0x117   :  { %v568_v58 = vmax.f32 %v426_v55, 0.0  ;;  %v429_v59 = vadd.f32 %v3176_v53, %v428_v57  ;;  %v430_v60 = vpop.f32.mrb[3].mxu0  ;;  %v2787_v55 = vld [vmem:[%s3733_s3 + $0x8] sm:$0xff]  }
 0x118   :  { %2548 = vmatpush3.bf16.msra.mxu1 %v2787_v55 }
 0x119   :  { %605 = vst.msk [vmem:[#allocation2] sm:$0xff] %vm604_vm0, %v568_v58  ;;  %v569_v61 = vmax.f32 %v429_v59, 0.0 }
 0x11b   :  { %606 = vst.msk [vmem:[#allocation2 + $0x8] sm:$0xff] %vm604_vm0, %v569_v61 }
 0x11c   :  { %v433_v62 = vpop.f32.mrb[4].mxu0 }
 0x11d   :  { %v434_v63 = vadd.f32 %v3176_v53, %v433_v62  ;;  %v435_v0 = vpop.f32.mrb[5].mxu0  ;;  %v2788_v62 = vld [vmem:[%s3733_s3 + $0x50] sm:$0xff]  }
 0x11e   :  { %v436_v2 = vpop.f32.mrb[6].mxu0  ;;  %v2789_v0 = vld [vmem:[%s3733_s3 + $0x10] sm:$0xff]   ;;  %2549 = vmatprep.subr.bf16.mxu1 %v2788_v62 }
 0x11f   :  { %v570_v3 = vmax.f32 %v434_v63, 0.0  ;;  %v437_v4 = vadd.f32 %v3176_v53, %v436_v2  ;;  %v438_v5 = vpop.f32.mrb[7].mxu0  ;;  %2550 = vmatpush3.bf16.msra.mxu1 %v2789_v0 }
 0x120   :  { %v641_v6 = vld [vmem:[#allocation2] sm:$0xff] }
 0x121   :  { %607 = vst.msk [vmem:[#allocation2 + $0x10] sm:$0xff] %vm604_vm0, %v570_v3  ;;  %v571_v7 = vmax.f32 %v437_v4, 0.0  ;;  %644 = vst.msk [vmem:[#allocation3] sm:$0xff] %vm604_vm0, %v641_v6  ;;  %v2790_v4 = vld [vmem:[%s3733_s3 + $0x58] sm:$0xff]  }
 0x122   :  { %v642_v8 = vld [vmem:[#allocation2 + $0x8] sm:$0xff]  ;;  %v2791_v6 = vld [vmem:[%s3733_s3 + $0x18] sm:$0xff]   ;;  %2551 = vmatprep.subr.bf16.mxu1 %v2790_v4 }
 0x123   :  { %608 = vst.msk [vmem:[#allocation2 + $0x18] sm:$0xff] %vm604_vm0, %v571_v7  ;;  %645 = vst.msk [vmem:[#allocation3 + $0x20] sm:$0xff] %vm604_vm0, %v642_v8  ;;  %2552 = vmatpush3.bf16.msra.mxu1 %v2791_v6 }
 0x124   :  { %v441_v9 = vpop.f32.mrb[8].mxu0 }
 0x125   :  { %v442_v10 = vadd.f32 %v3176_v53, %v441_v9  ;;  %v443_v11 = vpop.f32.mrb[9].mxu0 }
 0x126   :  { %v444_v12 = vpop.f32.mrb[10].mxu0 }
 0x127   :  { %v572_v13 = vmax.f32 %v442_v10, 0.0  ;;  %v445_v14 = vadd.f32 %v3176_v53, %v444_v12  ;;  %v446_v15 = vpop.f32.mrb[11].mxu0 }
 0x128   :  { %v643_v16 = vld [vmem:[#allocation2 + $0x10] sm:$0x3]  ;;  %v2793_v15 = vld [vmem:[%s3733_s3 + $0x20] sm:$0xff]  }
 0x129   :  { %609 = vst.msk [vmem:[#allocation2 + $0x20] sm:$0xff] %vm604_vm0, %v572_v13  ;;  %v573_v17 = vmax.f32 %v445_v14, 0.0  ;;  %v2792_v13 = vld [vmem:[%s3733_s3 + $0x60] sm:$0xff]  }
 0x12a   :  { %647 = vst.msk [vmem:[#allocation3 + $0x40] sm:$0x3] %vm646_vm1, %v643_v16  ;;  %v648_v18 = vld [vmem:[#allocation2 + $0x12] sm:$0xff]  ;;  %2553 = vmatprep.subr.bf16.mxu1 %v2792_v13 }
 0x12b   :  { %610 = vst.msk [vmem:[#allocation2 + $0x28] sm:$0xff] %vm604_vm0, %v573_v17  ;;  %654 = vrot.lane.b32.xlu1 %v648_v18, %s2934_s0  ;;  %2554 = vmatpush3.bf16.msra.mxu1 %v2793_v15  ;;  %v2794_v17 = vld [vmem:[%s3733_s3 + $0x68] sm:$0xff]  }
 0x12c   :  { %v449_v19 = vpop.f32.mrb[12].mxu0  ;;  %2555 = vmatprep.subr.bf16.mxu1 %v2794_v17 }
 0x12d   :  { %v450_v20 = vadd.f32 %v3176_v53, %v449_v19  ;;  %v451_v21 = vpop.f32.mrb[13].mxu0 }
 0x12e   :  { %v452_v22 = vpop.f32.mrb[14].mxu0 }
 0x12f   :  { %v574_v23 = vmax.f32 %v450_v20, 0.0  ;;  %v453_v24 = vadd.f32 %v3176_v53, %v452_v22  ;;  %v454_v25 = vpop.f32.mrb[15].mxu0  ;;  %v2795_v20 = vld [vmem:[%s3733_s3 + $0x28] sm:$0xff]  }
 0x130   :  { %v649_v26 = vld [vmem:[#allocation2 + $0x1a] sm:$0xff]  ;;  %v650_v30 = vld [vmem:[#allocation2 + $0x22] sm:$0x3]  ;;  %2556 = vmatpush3.bf16.msra.mxu1 %v2795_v20 }
 0x131   :  { %611 = vst.msk [vmem:[#allocation2 + $0x30] sm:$0xff] %vm604_vm0, %v574_v23  ;;  %v575_v27 = vmax.f32 %v453_v24, 0.0  ;;  %656 = vrot.lane.b32.xlu1 %v649_v26, %s2934_s0 }
 0x132   :  { %v668_v28 = vld [vmem:[#allocation2 + $0x24] sm:$0xff] }
 0x133   :  { %612 = vst.msk [vmem:[#allocation2 + $0x38] sm:$0xff] %vm604_vm0, %v575_v27  ;;  %674 = vrot.lane.b32.xlu0 %v668_v28, %s2935_s2  ;;  %v2796_v27 = vld [vmem:[%s3733_s3 + $0x70] sm:$0xff]  }
 0x134   :  { %v457_v29 = vpop.f32.mrb[16].mxu0  ;;  %2557 = vmatprep.subr.bf16.mxu1 %v2796_v27 }
 0x135   :  { %v458_v31 = vadd.f32 %v3176_v53, %v457_v29  ;;  %v459_v32 = vpop.f32.mrb[17].mxu0  ;;  %658 = vrot.lane.b32.xlu1 %v650_v30, %s2934_s0  ;;  %v2797_v29 = vld [vmem:[%s3733_s3 + $0x30] sm:$0xff]  }
 0x136   :  { %v460_v33 = vpop.f32.mrb[18].mxu0  ;;  %2558 = vmatpush3.bf16.msra.mxu1 %v2797_v29  ;;  %v2798_v32 = vld [vmem:[%s3733_s3 + $0x78] sm:$0xff]  }
 0x137   :  { %v576_v34 = vmax.f32 %v458_v31, 0.0  ;;  %v461_v35 = vadd.f32 %v3176_v53, %v460_v33  ;;  %v462_v36 = vpop.f32.mrb[19].mxu0  ;;  %2559 = vmatprep.subr.bf16.mxu1 %v2798_v32 }
 0x138   :  { %v669_v37 = vld [vmem:[#allocation2 + $0x2c] sm:$0xff] }
 0x139   :  { %613 = vst.msk [vmem:[#allocation2 + $0x40] sm:$0xff] %vm604_vm0, %v576_v34  ;;  %v577_v38 = vmax.f32 %v461_v35, 0.0  ;;  %676 = vrot.lane.b32.xlu1 %v669_v37, %s2935_s2  ;;  %v2799_v35 = vld [vmem:[%s3733_s3 + $0x38] sm:$0xff]  }
 0x13a   :  { %v688_v39 = vld [vmem:[#allocation2 + $0x36] sm:$0xff]  ;;  %2560 = vmatpush3.bf16.msra.mxu1 %v2799_v35  ;;  %v2800_v35 = vld [vmem:[%s3733_s3 + $0xc0] sm:$0xff]  }
 0x13b   :  { %614 = vst.msk [vmem:[#allocation2 + $0x48] sm:$0xff] %vm604_vm0, %v577_v38  ;;  %694 = vrot.lane.b32.xlu0 %v688_v39, %s2936_s24  ;;  %2573 = vmatprep.subr.bf16.mxu1 %v2800_v35 }
 0x13c   :  { %v465_v42 = vpop.f32.mrb[20].mxu0 }
 0x13d   :  { %v466_v43 = vadd.f32 %v3176_v53, %v465_v42  ;;  %v467_v44 = vpop.f32.mrb[21].mxu0 }
 0x13e   :  { %v468_v45 = vpop.f32.mrb[22].mxu0 }
 0x13f   :  { %v578_v46 = vmax.f32 %v466_v43, 0.0  ;;  %v469_v47 = vadd.f32 %v3176_v53, %v468_v45  ;;  %v470_v48 = vpop.f32.mrb[23].mxu0 }
 0x140   :  { %v689_v49 = vld [vmem:[#allocation2 + $0x3e] sm:$0xff] }
 0x141   :  { %615 = vst.msk [vmem:[#allocation2 + $0x50] sm:$0xff] %vm604_vm0, %v578_v46  ;;  %v579_v50 = vmax.f32 %v469_v47, 0.0  ;;  %696 = vrot.lane.b32.xlu1 %v689_v49, %s2936_s24 }
 0x142   :  { %v708_v51 = vld [vmem:[#allocation2 + $0x48] sm:$0xff] }
 0x143   :  { %616 = vst.msk [vmem:[#allocation2 + $0x58] sm:$0xff] %vm604_vm0, %v579_v50  ;;  %711 = vst.msk [vmem:[#allocation3 + $0x8] sm:$0xff] %vm604_vm0, %v708_v51  ;;  %v670_v50 = vld [vmem:[#allocation2 + $0x34] sm:$0x3] }
 0x144   :  { %v473_v54 = vpop.f32.mrb[24].mxu0 }
 0x145   :  { %v474_v56 = vadd.f32 %v3176_v53, %v473_v54  ;;  %v475_v57 = vpop.f32.mrb[25].mxu0 }
 0x146   :  { %v476_v58 = vpop.f32.mrb[26].mxu0 }
 0x147   :  { %v580_v59 = vmax.f32 %v474_v56, 0.0  ;;  %v477_v60 = vadd.f32 %v3176_v53, %v476_v58  ;;  %v478_v61 = vpop.f32.mrb[27].mxu0  ;;  %v690_v58 = vld [vmem:[#allocation2 + $0x46] sm:$0x3] }
 0x148   :  { %v709_v63 = vld [vmem:[#allocation2 + $0x50] sm:$0xff] }
 0x149   :  { %617 = vst.msk [vmem:[#allocation2 + $0x60] sm:$0xff] %vm604_vm0, %v580_v59  ;;  %v581_v2 = vmax.f32 %v477_v60, 0.0  ;;  %712 = vst.msk [vmem:[#allocation3 + $0x28] sm:$0xff] %vm604_vm0, %v709_v63 }
 0x14a   :  { %v710_v3 = vld [vmem:[#allocation2 + $0x58] sm:$0x3] }
 0x14b   :  { %618 = vst.msk [vmem:[#allocation2 + $0x68] sm:$0xff] %vm604_vm0, %v581_v2 }
 0x14c   :  { %713 = vst.msk [vmem:[#allocation3 + $0x48] sm:$0x3] %vm646_vm1, %v710_v3  ;;  %v481_v5 = vpop.f32.mrb[28].mxu0 }
 0x14d   :  { %v482_v7 = vadd.f32 %v3176_v53, %v481_v5  ;;  %v483_v8 = vpop.f32.mrb[29].mxu0 }
 0x14e   :  { %v484_v9 = vpop.f32.mrb[30].mxu0 }
 0x14f   :  { %v582_v10 = vmax.f32 %v482_v7, 0.0  ;;  %v485_v11 = vadd.f32 %v3176_v53, %v484_v9  ;;  %v486_v12 = vpop.f32.mrb[31].mxu0 }
 0x150   :  { %v714_v14 = vld [vmem:[#allocation2 + $0x5a] sm:$0xff] }
 0x151   :  { %619 = vst.msk [vmem:[#allocation2 + $0x70] sm:$0xff] %vm604_vm0, %v582_v10  ;;  %v583_v16 = vmax.f32 %v485_v11, 0.0  ;;  %720 = vrot.lane.b32.xlu0 %v714_v14, %s2934_s0 }
 0x152   :  { %v715_v19 = vld [vmem:[#allocation2 + $0x62] sm:$0xff]  ;;  %v716_v28 = vld [vmem:[#allocation2 + $0x6a] sm:$0x3] }
 0x153   :  { %620 = vst.msk [vmem:[#allocation2 + $0x78] sm:$0xff] %vm604_vm0, %v583_v16 }
 0x154   :  { %v489_v18 = vpop.f32.mrb[32].mxu0 }
 0x155   :  { %v490_v21 = vadd.f32 %v3176_v53, %v489_v18  ;;  %v491_v22 = vpop.f32.mrb[33].mxu0  ;;  %722 = vrot.lane.b32.xlu0 %v715_v19, %s2934_s0 }
 0x156   :  { %v492_v23 = vpop.f32.mrb[34].mxu0 }
 0x157   :  { %v584_v24 = vmax.f32 %v490_v21, 0.0  ;;  %v493_v25 = vadd.f32 %v3176_v53, %v492_v23  ;;  %v494_v26 = vpop.f32.mrb[35].mxu0 }
 0x158   :  { %v732_v34 = vld [vmem:[#allocation2 + $0x6c] sm:$0xff] }
 0x159   :  { %621 = vst.msk [vmem:[#allocation2 + $0x80] sm:$0xff] %vm604_vm0, %v584_v24  ;;  %v585_v30 = vmax.f32 %v493_v25, 0.0  ;;  %724 = vrot.lane.b32.xlu0 %v716_v28, %s2934_s0 }
 0x15a   :  { %v733_v31 = vld [vmem:[#allocation2 + $0x74] sm:$0xff]  ;;  %v734_v46 = vld [vmem:[#allocation2 + $0x7c] sm:$0x3] }
 0x15b   :  { %622 = vst.msk [vmem:[#allocation2 + $0x88] sm:$0xff] %vm604_vm0, %v585_v30  ;;  %740 = vrot.lane.b32.xlu1 %v733_v31, %s2935_s2 }
 0x15c   :  { %v497_v33 = vpop.f32.mrb[36].mxu0 }
 0x15d   :  { %v498_v36 = vadd.f32 %v3176_v53, %v497_v33  ;;  %v499_v37 = vpop.f32.mrb[37].mxu0  ;;  %738 = vrot.lane.b32.xlu0 %v732_v34, %s2935_s2 }
 0x15e   :  { %v500_v38 = vpop.f32.mrb[38].mxu0 }
 0x15f   :  { %v586_v39 = vmax.f32 %v498_v36, 0.0  ;;  %v501_v40 = vadd.f32 %v3176_v53, %v500_v38  ;;  %v502_v41 = vpop.f32.mrb[39].mxu0 }
 0x160   :  { %v750_v42 = vld [vmem:[#allocation2 + $0x7e] sm:$0xff] }
 0x161   :  { %623 = vst.msk [vmem:[#allocation2 + $0x90] sm:$0xff] %vm604_vm0, %v586_v39  ;;  %v587_v43 = vmax.f32 %v501_v40, 0.0  ;;  %756 = vrot.lane.b32.xlu0 %v750_v42, %s2936_s24 }
 0x162   :  { %v751_v44 = vld [vmem:[#allocation2 + $0x86] sm:$0xff]  ;;  %v752_v55 = vld [vmem:[#allocation2 + $0x8e] sm:$0x3] }
 0x163   :  { %624 = vst.msk [vmem:[#allocation2 + $0x98] sm:$0xff] %vm604_vm0, %v587_v43  ;;  %758 = vrot.lane.b32.xlu1 %v751_v44, %s2936_s24 }
 0x164   :  { %v505_v45 = vpop.f32.mrb[40].mxu0 }
 0x165   :  { %v506_v47 = vadd.f32 %v3176_v53, %v505_v45  ;;  %v507_v48 = vpop.f32.mrb[41].mxu0  ;;  %742 = vrot.lane.b32.xlu0 %v734_v46, %s2935_s2 }
 0x166   :  { %v508_v49 = vpop.f32.mrb[42].mxu0 }
 0x167   :  { %v588_v51 = vmax.f32 %v506_v47, 0.0  ;;  %v509_v52 = vadd.f32 %v3176_v53, %v508_v49  ;;  %v510_v54 = vpop.f32.mrb[43].mxu0  ;;  %678 = vrot.lane.b32.xlu1 %v670_v50, %s2935_s2 }
 0x168   :  { %v768_v56 = vld [vmem:[#allocation2 + $0x90] sm:$0xff] }
 0x169   :  { %625 = vst.msk [vmem:[#allocation2 + $0xa0] sm:$0xff] %vm604_vm0, %v588_v51  ;;  %v589_v57 = vmax.f32 %v509_v52, 0.0  ;;  %760 = vrot.lane.b32.xlu0 %v752_v55, %s2936_s24  ;;  %771 = vst.msk [vmem:[#allocation3 + $0x10] sm:$0xff] %vm604_vm0, %v768_v56 }
 0x16a   :  { %v769_v59 = vld [vmem:[#allocation2 + $0x98] sm:$0xff] }
 0x16b   :  { %626 = vst.msk [vmem:[#allocation2 + $0xa8] sm:$0xff] %vm604_vm0, %v589_v57  ;;  %698 = vrot.lane.b32.xlu1 %v690_v58, %s2936_s24  ;;  %772 = vst.msk [vmem:[#allocation3 + $0x30] sm:$0xff] %vm604_vm0, %v769_v59 }
 0x16c   :  { %v513_v60 = vpop.f32.mrb[44].mxu0 }
 0x16d   :  { %v514_v61 = vadd.f32 %v3176_v53, %v513_v60  ;;  %v515_v62 = vpop.f32.mrb[45].mxu0 }
 0x16e   :  { %v516_v63 = vpop.f32.mrb[46].mxu0 }
 0x16f   :  { %v590_v0 = vmax.f32 %v514_v61, 0.0  ;;  %v517_v2 = vadd.f32 %v3176_v53, %v516_v63  ;;  %v518_v3 = vpop.f32.mrb[47].mxu0 }
 0x170   :  { %v770_v4 = vld [vmem:[#allocation2 + $0xa0] sm:$0x3] }
 0x171   :  { %627 = vst.msk [vmem:[#allocation2 + $0xb0] sm:$0xff] %vm604_vm0, %v590_v0  ;;  %v591_v5 = vmax.f32 %v517_v2, 0.0 }
 0x172   :  { %773 = vst.msk [vmem:[#allocation3 + $0x50] sm:$0x3] %vm646_vm1, %v770_v4  ;;  %v774_v6 = vld [vmem:[#allocation2 + $0xa2] sm:$0xff] }
 0x173   :  { %628 = vst.msk [vmem:[#allocation2 + $0xb8] sm:$0xff] %vm604_vm0, %v591_v5  ;;  %780 = vrot.lane.b32.xlu0 %v774_v6, %s2934_s0 }
 0x174   :  { %v521_v7 = vpop.f32.mrb[48].mxu0 }
 0x175   :  { %v522_v8 = vadd.f32 %v3176_v53, %v521_v7  ;;  %v523_v9 = vpop.f32.mrb[49].mxu0 }
 0x176   :  { %v524_v10 = vpop.f32.mrb[50].mxu0 }
 0x177   :  { %v592_v11 = vmax.f32 %v522_v8, 0.0  ;;  %v525_v12 = vadd.f32 %v3176_v53, %v524_v10  ;;  %v526_v13 = vpop.f32.mrb[51].mxu0 }
 0x178   :  { %v775_v14 = vld [vmem:[#allocation2 + $0xaa] sm:$0xff] }
 0x179   :  { %629 = vst.msk [vmem:[#allocation2 + $0xc0] sm:$0xff] %vm604_vm0, %v592_v11  ;;  %v593_v15 = vmax.f32 %v525_v12, 0.0  ;;  %782 = vrot.lane.b32.xlu1 %v775_v14, %s2934_s0  ;;  %v776_v14 = vld [vmem:[#allocation2 + $0xb2] sm:$0x3] }
 0x17a   :  { %v792_v16 = vld [vmem:[#allocation2 + $0xb4] sm:$0xff] }
 0x17b   :  { %630 = vst.msk [vmem:[#allocation2 + $0xc8] sm:$0xff] %vm604_vm0, %v593_v15  ;;  %798 = vrot.lane.b32.xlu0 %v792_v16, %s2935_s2 }
 0x17c   :  { %v529_v17 = vpop.f32.mrb[52].mxu0 }
 0x17d   :  { %v530_v18 = vadd.f32 %v3176_v53, %v529_v17  ;;  %v531_v19 = vpop.f32.mrb[53].mxu0 }
 0x17e   :  { %v532_v20 = vpop.f32.mrb[54].mxu0 }
 0x17f   :  { %v594_v21 = vmax.f32 %v530_v18, 0.0  ;;  %v533_v22 = vadd.f32 %v3176_v53, %v532_v20  ;;  %v534_v23 = vpop.f32.mrb[55].mxu0 }
 0x180   :  { %v793_v24 = vld [vmem:[#allocation2 + $0xbc] sm:$0xff]  ;;  %v794_v17 = vld [vmem:[#allocation2 + $0xc4] sm:$0x3] }
 0x181   :  { %631 = vst.msk [vmem:[#allocation2 + $0xd0] sm:$0xff] %vm604_vm0, %v594_v21  ;;  %v595_v25 = vmax.f32 %v533_v22, 0.0  ;;  %800 = vrot.lane.b32.xlu1 %v793_v24, %s2935_s2 }
 0x182   :  { %v810_v10 = vld [vmem:[#allocation2 + $0xc6] sm:$0xff] }
 0x183   :  { %632 = vst.msk [vmem:[#allocation2 + $0xd8] sm:$0xff] %vm604_vm0, %v595_v25 }
 0x184   :  { %v537_v26 = vpop.f32.mrb[56].mxu0 }
 0x185   :  { %v538_v27 = vadd.f32 %v3176_v53, %v537_v26  ;;  %v539_v28 = vpop.f32.mrb[57].mxu0 }
 0x186   :  { %v540_v29 = vpop.f32.mrb[58].mxu0 }
 0x187   :  { %v596_v30 = vmax.f32 %v538_v27, 0.0  ;;  %v541_v31 = vadd.f32 %v3176_v53, %v540_v29  ;;  %v542_v32 = vpop.f32.mrb[59].mxu0 }
 0x188   :  { %v811_v12 = vld [vmem:[#allocation2 + $0xce] sm:$0xff]  ;;  %v812_v19 = vld [vmem:[#allocation2 + $0xd6] sm:$0x3] }
 0x189   :  { %633 = vst.msk [vmem:[#allocation2 + $0xe0] sm:$0xff] %vm604_vm0, %v596_v30  ;;  %v597_v33 = vmax.f32 %v541_v31, 0.0 }
 0x18a   :  { %v828_v34 = vld [vmem:[#allocation2 + $0xd8] sm:$0xff] }
 0x18b   :  { %634 = vst.msk [vmem:[#allocation2 + $0xe8] sm:$0xff] %vm604_vm0, %v597_v33  ;;  %831 = vst.msk [vmem:[#allocation3 + $0x18] sm:$0xff] %vm604_vm0, %v828_v34 }
 0x18c   :  { %v545_v36 = vpop.f32.mrb[60].mxu0 }
 0x18d   :  { %v546_v37 = vadd.f32 %v3176_v53, %v545_v36  ;;  %v547_v38 = vpop.f32.mrb[61].mxu0  ;;  %v2801_v36 = vld [vmem:[%s3733_s3 + $0x80] sm:$0xff]  }
 0x18e   :  { %v548_v39 = vpop.f32.mrb[62].mxu0  ;;  %v2802_v38 = vld [vmem:[%s3733_s3 + $0xc8] sm:$0xff]  }
 0x18f   :  { %v598_v40 = vmax.f32 %v546_v37, 0.0  ;;  %v549_v41 = vadd.f32 %v3176_v53, %v548_v39  ;;  %v550_v42 = vpop.f32.mrb[63].mxu0  ;;  %v2803_v39 = vld [vmem:[%s3733_s3 + $0x88] sm:$0xff]  }
 0x190   :  { %v829_v43 = vld [vmem:[#allocation2 + $0xe0] sm:$0xff] }
 0x191   :  { %635 = vst.msk [vmem:[#allocation2 + $0xf0] sm:$0xff] %vm604_vm0, %v598_v40  ;;  %v599_v44 = vmax.f32 %v549_v41, 0.0  ;;  %832 = vst.msk [vmem:[#allocation3 + $0x38] sm:$0xff] %vm604_vm0, %v829_v43  ;;  %v2804_v41 = vld [vmem:[%s3733_s3 + $0xd0] sm:$0xff]  }
 0x192   :  { %v830_v45 = vld [vmem:[#allocation2 + $0xe8] sm:$0x3] }
 0x193   :  { %636 = vst.msk [vmem:[#allocation2 + $0xf8] sm:$0xff] %vm604_vm0, %v599_v44 }
 0x194   :  { %833 = vst.msk [vmem:[#allocation3 + $0x58] sm:$0x3] %vm646_vm1, %v830_v45  ;;  %v553_v46 = vpop.f32.mrb[64].mxu0 }
 0x195   :  { %v554_v47 = vadd.f32 %v3176_v53, %v553_v46  ;;  %v555_v48 = vpop.f32.mrb[65].mxu0  ;;  %v2805_v46 = vld [vmem:[%s3733_s3 + $0x90] sm:$0xff]  }
 0x196   :  { %v556_v49 = vpop.f32.mrb[66].mxu0  ;;  %v2807_v48 = vld [vmem:[%s3733_s3 + $0x98] sm:$0xff]  }
 0x197   :  { %v600_v50 = vmax.f32 %v554_v47, 0.0  ;;  %v557_v51 = vadd.f32 %v3176_v53, %v556_v49  ;;  %v558_v52 = vpop.f32.mrb[67].mxu0  ;;  %v2806_v47 = vld [vmem:[%s3733_s3 + $0xd8] sm:$0xff]  }
 0x198   :  { %v834_v54 = vld [vmem:[#allocation2 + $0xea] sm:$0xff]  ;;  %v2809_v52 = vld [vmem:[%s3733_s3 + $0xa0] sm:$0xff]  }
 0x199   :  { %637 = vst.msk [vmem:[#allocation2 + $0x100] sm:$0xff] %vm604_vm0, %v600_v50  ;;  %v601_v55 = vmax.f32 %v557_v51, 0.0  ;;  %840 = vrot.lane.b32.xlu0 %v834_v54, %s2934_s0  ;;  %v2808_v50 = vld [vmem:[%s3733_s3 + $0xe0] sm:$0xff]   ;;  %v2810_v54 = vld [vmem:[%s3733_s3 + $0xe8] sm:$0xff]  }
 0x19a   :  { %v835_v56 = vld [vmem:[#allocation2 + $0xf2] sm:$0xff]  ;;  %v836_v13 = vld [vmem:[#allocation2 + $0xfa] sm:$0x3] }
 0x19b   :  { %638 = vst.msk [vmem:[#allocation2 + $0x108] sm:$0xff] %vm604_vm0, %v601_v55  ;;  %842 = vrot.lane.b32.xlu1 %v835_v56, %s2934_s0  ;;  %v2811_v55 = vld [vmem:[%s3733_s3 + $0xa8] sm:$0xff]  }
 0x19c   :  { %v561_v57 = vpop.f32.mrb[68].mxu0 }
 0x19d   :  { %v562_v58 = vadd.f32 %v3176_v53, %v561_v57  ;;  %v563_v59 = vpop.f32.mrb[69].mxu0  ;;  %v655_v60 = vpop.permute.xlu1 %654  ;;  %v2812_v57 = vld [vmem:[%s3733_s3 + $0xf0] sm:$0xff]  }
 0x19e   :  { %664 = vst.msk [vmem:[#allocation3] sm:$0xff] %vm663_vm2, %v655_v60  ;;  %v564_v61 = vpop.f32.mrb[70].mxu0  ;;  %v2814_v59 = vld [vmem:[%s3733_s3 + $0xf8] sm:$0xff]  }
 0x19f   :  { %v602_v62 = vmax.f32 %v562_v58, 0.0  ;;  %v565_v63 = vadd.f32 %v3176_v53, %v564_v61  ;;  %v566_v0 = vpop.f32.mrb[71].mxu0  ;;  %v2813_v58 = vld [vmem:[%s3733_s3 + $0xb0] sm:$0xff]   ;;  %v2815_v60 = vld [vmem:[%s3733_s3 + $0xb8] sm:$0xff]  }
 0x1a0   :  { %v852_v2 = vld [vmem:[#allocation2 + $0xfc] sm:$0xff] }
 0x1a1   :  { %639 = vst.msk [vmem:[#allocation2 + $0x110] sm:$0xff] %vm604_vm0, %v602_v62  ;;  %v603_v3 = vmax.f32 %v565_v63, 0.0  ;;  %858 = vrot.lane.b32.xlu0 %v852_v2, %s2935_s2 }
 0x1a2   :  { %v853_v4 = vld [vmem:[#allocation2 + $0x104] sm:$0xff]  ;;  %v854_v16 = vld [vmem:[#allocation2 + $0x10c] sm:$0x3] }
 0x1a3   :  { %640 = vst.msk [vmem:[#allocation2 + $0x118] sm:$0xff] %vm604_vm0, %v603_v3  ;;  %860 = vrot.lane.b32.xlu1 %v853_v4, %s2935_s2  ;;  %v657_v5 = vpop.permute.xlu1 %656 }
 0x1a4   :  { %665 = vst.msk [vmem:[#allocation3 + $0x20] sm:$0xff] %vm663_vm2, %v657_v5 }
 0x1a5   :  { %v675_v6 = vpop.permute.xlu0 %674 }
 0x1a6   :  { %684 = vst.msk [vmem:[#allocation3] sm:$0xff] %vm683_vm3, %v675_v6 }
 0x1a7   :  { %v659_v53 = vpop.permute.xlu1 %658 }
 0x1a8   :  { %667 = vst.msk [vmem:[#allocation3 + $0x40] sm:$0x3] %vm666_vm4, %v659_v53  ;;  %v870_v7 = vld [vmem:[#allocation2 + $0x10e] sm:$0xff] }
 0x1a9   :  { %876 = vrot.lane.b32.xlu0 %v870_v7, %s2936_s24 }
 0x1aa   :  { %v871_v8 = vld [vmem:[#allocation2 + $0x116] sm:$0xff]  ;;  %v872_v18 = vld [vmem:[#allocation2 + $0x11e] sm:$0x3] }
 0x1ab   :  { %878 = vrot.lane.b32.xlu1 %v871_v8, %s2936_s24  ;;  %v677_v9 = vpop.permute.xlu1 %676 }
 0x1ac   :  { %685 = vst.msk [vmem:[#allocation3 + $0x20] sm:$0xff] %vm683_vm3, %v677_v9 }
 0x1ad   :  { %816 = vrot.lane.b32.xlu0 %v810_v10, %s2936_s24  ;;  %v695_v11 = vpop.permute.xlu0 %694 }
 0x1ae   :  { %704 = vst.msk [vmem:[#allocation3] sm:$0xff] %vm703_vm5, %v695_v11 }
 0x1af   :  { %818 = vrot.lane.b32.xlu1 %v811_v12, %s2936_s24 }
 0x1b1   :  { %844 = vrot.lane.b32.xlu0 %v836_v13, %s2934_s0 }
 0x1b3   :  { %784 = vrot.lane.b32.xlu1 %v776_v14, %s2934_s0  ;;  %v697_v15 = vpop.permute.xlu1 %696 }
 0x1b4   :  { %705 = vst.msk [vmem:[#allocation3 + $0x20] sm:$0xff] %vm703_vm5, %v697_v15 }
 0x1b5   :  { %862 = vrot.lane.b32.xlu0 %v854_v16, %s2935_s2  ;;  %v888_v35 = vld [vmem:[#allocation3] sm:$0xff] }
 0x1b7   :  { %802 = vrot.lane.b32.xlu1 %v794_v17, %s2935_s2 }
 0x1b9   :  { %880 = vrot.lane.b32.xlu0 %v872_v18, %s2936_s24 }
 0x1bb   :  { %820 = vrot.lane.b32.xlu1 %v812_v19, %s2936_s24  ;;  %v892_v30 = vld [vmem:[#allocation3 + $0x20] sm:$0xff] }
 0x1bc   :  { %v900_v37 = vpack.c.bf16 %v892_v30, %v888_v35 }
 0x1c3   :  { %v721_v20 = vpop.permute.xlu0 %720 }
 0x1c4   :  { %729 = vst.msk [vmem:[#allocation3 + $0x8] sm:$0xff] %vm663_vm2, %v721_v20 }
 0x1c7   :  { %v723_v21 = vpop.permute.xlu0 %722 }
 0x1c8   :  { %730 = vst.msk [vmem:[#allocation3 + $0x28] sm:$0xff] %vm663_vm2, %v723_v21  ;;  %v2816_v21 = vld [vmem:[%s3735_s5 + $0x40] sm:$0xff]  }
 0x1cb   :  { %v725_v22 = vpop.permute.xlu0 %724 }
 0x1cc   :  { %731 = vst.msk [vmem:[#allocation3 + $0x48] sm:$0x3] %vm666_vm4, %v725_v22  ;;  %v2817_v22 = vld [vmem:[%s3735_s5] sm:$0xff]  }
 0x1cd   :  { %v741_v23 = vpop.permute.xlu1 %740 }
 0x1ce   :  { %748 = vst.msk [vmem:[#allocation3 + $0x28] sm:$0xff] %vm683_vm3, %v741_v23  ;;  %v2818_v23 = vld [vmem:[%s3735_s5 + $0x48] sm:$0xff]  }
 0x1cf   :  { %v739_v24 = vpop.permute.xlu0 %738 }
 0x1d0   :  { %747 = vst.msk [vmem:[#allocation3 + $0x8] sm:$0xff] %vm683_vm3, %v739_v24  ;;  %v2819_v24 = vld [vmem:[%s3735_s5 + $0x8] sm:$0xff]  }
 0x1d3   :  { %v757_v25 = vpop.permute.xlu0 %756 }
 0x1d4   :  { %765 = vst.msk [vmem:[#allocation3 + $0x8] sm:$0xff] %vm703_vm5, %v757_v25  ;;  %v2820_v25 = vld [vmem:[%s3735_s5 + $0x50] sm:$0xff]  }
 0x1d5   :  { %v759_v26 = vpop.permute.xlu1 %758 }
 0x1d6   :  { %766 = vst.msk [vmem:[#allocation3 + $0x28] sm:$0xff] %vm703_vm5, %v759_v26  ;;  %v2821_v26 = vld [vmem:[%s3735_s5 + $0x10] sm:$0xff]  }
 0x1d7   :  { %v743_v27 = vpop.permute.xlu0 %742 }
 0x1d8   :  { %749 = vst.msk [vmem:[#allocation3 + $0x48] sm:$0x3] %vm686_vm6, %v743_v27  ;;  %v2822_v27 = vld [vmem:[%s3735_s5 + $0x58] sm:$0xff]  }
 0x1d9   :  { %v679_v28 = vpop.permute.xlu1 %678 }
 0x1da   :  { %687 = vst.msk [vmem:[#allocation3 + $0x40] sm:$0x3] %vm686_vm6, %v679_v28  ;;  %v2823_v28 = vld [vmem:[%s3735_s5 + $0x18] sm:$0xff]  }
 0x1db   :  { %v761_v29 = vpop.permute.xlu0 %760  ;;  %v889_v32 = vld [vmem:[#allocation3 + $0x8] sm:$0xff] }
 0x1dc   :  { %767 = vst.msk [vmem:[#allocation3 + $0x48] sm:$0x3] %vm706_vm7, %v761_v29 }
 0x1dd   :  { %v699_v31 = vpop.permute.xlu1 %698  ;;  %v893_v33 = vld [vmem:[#allocation3 + $0x28] sm:$0xff] }
 0x1de   :  { %707 = vst.msk [vmem:[#allocation3 + $0x40] sm:$0x3] %vm706_vm7, %v699_v31  ;;  %v901_v34 = vpack.c.bf16 %v893_v33, %v889_v32 }
 0x1e0   :  { %1203 = vmatprep.mubr.bf16.mxu1 %v901_v34 }
 0x1e1   :  { %1204 = vmatmul.mubr.bf16.vlgmr.msra.gmra.mrb[0].mxu1 %v900_v37 }
 0x1e2   :  { %2574 = vmatpush3.bf16.msra.mxu1 %v2801_v36 }
 0x1e3   :  { %v897_v40 = vld [vmem:[#allocation3 + $0x48] sm:$0x3]  ;;  %2575 = vmatprep.subr.bf16.mxu1 %v2802_v38 }
 0x1e4   :  { %v905_v42 = vpack.c.bf16 %v897_v40, %v897_v40  ;;  %v2418_v40 = vld [vmem:[%s3734_s4] ss:$0 sm:$0xff]  ;;  %s2940_s4 = smov [#allocation6]  }
 0x1e5   :  { %v781_v43 = vpop.permute.xlu0 %780  ;;  %v896_v44 = vld [vmem:[#allocation3 + $0x40] sm:$0x3]  ;;  %s2357_s3 = sshll.u32 %s2940_s4, 4  ;;  %s2358_s3 = int_to_ptr.vmem [resolvable:$true] %s2357_s3 }
 0x1e6   :  { %789 = vst.msk [vmem:[#allocation3 + $0x10] sm:$0xff] %vm663_vm2, %v781_v43  ;;  %1211 = vmatprep.mubr.bf16.mxu1 %v905_v42  ;;  %v904_v45 = vpack.c.bf16 %v896_v44, %v896_v44  ;;  %2576 = vmatpush3.bf16.msra.mxu1 %v2803_v39  ;;  %s2909_s28 = scalar_lea.vmem %s2358_s3, 32  ;;  %p2914_p1 = scmp.lt.s32.totalorder %s2358_s3, %s2358_s3 }
 0x1e7   :  { %2577 = vmatprep.subr.bf16.mxu1 %v2804_v41  ;;  %p2910_p0 = scmp.ne.s32.totalorder %s2358_s3, %s2909_s28  ;;  %p2915_p2 = scmp.lt.s32.totalorder %s2909_s28, %s2909_s28 }
 0x1e9   :  { %1212 = vmatmul.mubr.bf16.gmra.mrb[4].mxu1 %v904_v45  ;;  %p2916_p3 = por %p2915_p2, %p2914_p1 }
 0x1ea   :  { %2578 = vmatpush3.bf16.msra.mxu1 %v2805_v46 }
 0x1eb   :  { %v783_v49 = vpop.permute.xlu1 %782  ;;  %2579 = vmatprep.subr.bf16.mxu1 %v2806_v47  ;;  %p2917_p4 = pnand %p2916_p3, %p2910_p0 }
 0x1ec   :  { %790 = vst.msk [vmem:[#allocation3 + $0x30] sm:$0xff] %vm663_vm2, %v783_v49 }
 0x1ed   :  { %v799_v51 = vpop.permute.xlu0 %798 }
 0x1ee   :  { %807 = vst.msk [vmem:[#allocation3 + $0x10] sm:$0xff] %vm683_vm3, %v799_v51  ;;  %2580 = vmatpush3.bf16.msra.mxu1 %v2807_v48  ;;  %v2825_v51 = vld [vmem:[%s3735_s5 + $0x20] sm:$0xff]  }
 0x1ef   :  { %2581 = vmatprep.subr.bf16.mxu1 %v2808_v50  ;;  %v2824_v50 = vld [vmem:[%s3735_s5 + $0x60] sm:$0xff]  }
 0x1f2   :  { %2582 = vmatpush3.bf16.msra.mxu1 %v2809_v52 }
 0x1f3   :  { %v801_v56 = vpop.permute.xlu1 %800  ;;  %2583 = vmatprep.subr.bf16.mxu1 %v2810_v54 }
 0x1f4   :  { %808 = vst.msk [vmem:[#allocation3 + $0x30] sm:$0xff] %vm683_vm3, %v801_v56  ;;  %v2826_v56 = vld [vmem:[%s3735_s5 + $0x68] sm:$0xff]  }
 0x1f6   :  { %2584 = vmatpush3.bf16.msra.mxu1 %v2811_v55 }
 0x1f7   :  { %2585 = vmatprep.subr.bf16.mxu1 %v2812_v57  ;;  %v2827_v57 = vld [vmem:[%s3735_s5 + $0x28] sm:$0xff]  }
 0x1fa   :  { %2586 = vmatpush3.bf16.msra.mxu1 %v2813_v58  ;;  %v2828_v58 = vld [vmem:[%s3735_s5 + $0x70] sm:$0xff]  }
 0x1fb   :  { %2587 = vmatprep.subr.bf16.mxu1 %v2814_v59  ;;  %v2829_v59 = vld [vmem:[%s3735_s5 + $0x30] sm:$0xff]  }
 0x1fe   :  { %2588 = vmatpush3.bf16.msra.mxu1 %v2815_v60 }
 0x1ff   :  { %2601 = vmatprep.subr.bf16.mxu1 %v2816_v21 }
 0x20b   :  { %v841_v61 = vpop.permute.xlu0 %840 }
 0x20c   :  { %849 = vst.msk [vmem:[#allocation3 + $0x18] sm:$0xff] %vm663_vm2, %v841_v61  ;;  %v2830_v61 = vld [vmem:[%s3735_s5 + $0x78] sm:$0xff]  }
 0x20d   :  { %v843_v62 = vpop.permute.xlu1 %842 }
 0x20e   :  { %850 = vst.msk [vmem:[#allocation3 + $0x38] sm:$0xff] %vm663_vm2, %v843_v62 }
 0x213   :  { %v859_v63 = vpop.permute.xlu0 %858 }
 0x214   :  { %867 = vst.msk [vmem:[#allocation3 + $0x18] sm:$0xff] %vm683_vm3, %v859_v63 }
 0x215   :  { %v861_v0 = vpop.permute.xlu1 %860 }
 0x216   :  { %868 = vst.msk [vmem:[#allocation3 + $0x38] sm:$0xff] %vm683_vm3, %v861_v0 }
 0x21b   :  { %v877_v2 = vpop.permute.xlu0 %876 }
 0x21c   :  { %885 = vst.msk [vmem:[#allocation3 + $0x18] sm:$0xff] %vm703_vm5, %v877_v2 }
 0x21d   :  { %v879_v3 = vpop.permute.xlu1 %878 }
 0x21e   :  { %886 = vst.msk [vmem:[#allocation3 + $0x38] sm:$0xff] %vm703_vm5, %v879_v3 }
 0x21f   :  { %v817_v4 = vpop.permute.xlu0 %816 }
 0x220   :  { %825 = vst.msk [vmem:[#allocation3 + $0x10] sm:$0xff] %vm703_vm5, %v817_v4 }
 0x221   :  { %v819_v5 = vpop.permute.xlu1 %818 }
 0x222   :  { %826 = vst.msk [vmem:[#allocation3 + $0x30] sm:$0xff] %vm703_vm5, %v819_v5  ;;  %v2831_v5 = vld [vmem:[%s3735_s5 + $0x38] sm:$0xff]  }
 0x223   :  { %v845_v6 = vpop.permute.xlu0 %844  ;;  %v891_v7 = vld [vmem:[#allocation3 + $0x18] sm:$0xff] }
 0x224   :  { %851 = vst.msk [vmem:[#allocation3 + $0x58] sm:$0x3] %vm666_vm4, %v845_v6 }
 0x225   :  { %v785_v53 = vpop.permute.xlu1 %784  ;;  %v895_v8 = vld [vmem:[#allocation3 + $0x38] sm:$0xff] }
 0x226   :  { %791 = vst.msk [vmem:[#allocation3 + $0x50] sm:$0x3] %vm666_vm4, %v785_v53  ;;  %v903_v9 = vpack.c.bf16 %v895_v8, %v891_v7 }
 0x227   :  { %v863_v10 = vpop.permute.xlu0 %862  ;;  %v890_v12 = vld [vmem:[#allocation3 + $0x10] sm:$0xff] }
 0x228   :  { %869 = vst.msk [vmem:[#allocation3 + $0x58] sm:$0x3] %vm686_vm6, %v863_v10  ;;  %1251 = vmatprep.mubr.bf16.mxu1 %v903_v9 }
 0x229   :  { %v803_v11 = vpop.permute.xlu1 %802  ;;  %v894_v13 = vld [vmem:[#allocation3 + $0x30] sm:$0xff] }
 0x22a   :  { %809 = vst.msk [vmem:[#allocation3 + $0x50] sm:$0x3] %vm686_vm6, %v803_v11  ;;  %v902_v14 = vpack.c.bf16 %v894_v13, %v890_v12 }
 0x22b   :  { %v881_v15 = vpop.permute.xlu0 %880 }
 0x22c   :  { %887 = vst.msk [vmem:[#allocation3 + $0x58] sm:$0x3] %vm706_vm7, %v881_v15  ;;  %1252 = vmatmul.mubr.bf16.vlgmr.msra.gmra.mrb[8].mxu1 %v902_v14  ;;  %v2832_v14 = vld [vmem:[%s3735_s5 + $0xc0] sm:$0xff]  }
 0x22d   :  { %v821_v16 = vpop.permute.xlu1 %820  ;;  %2602 = vmatpush3.bf16.msra.mxu1 %v2817_v22 }
 0x22e   :  { %827 = vst.msk [vmem:[#allocation3 + $0x50] sm:$0x3] %vm706_vm7, %v821_v16  ;;  %2603 = vmatprep.subr.bf16.mxu1 %v2818_v23 }
 0x231   :  { %2604 = vmatpush3.bf16.msra.mxu1 %v2819_v24 }
 0x232   :  { %2605 = vmatprep.subr.bf16.mxu1 %v2820_v25 }
 0x233   :  { %v899_v17 = vld [vmem:[#allocation3 + $0x58] sm:$0x3] }
 0x234   :  { %v907_v18 = vpack.c.bf16 %v899_v17, %v899_v17 }
 0x235   :  { %v898_v19 = vld [vmem:[#allocation3 + $0x50] sm:$0x3]  ;;  %2606 = vmatpush3.bf16.msra.mxu1 %v2821_v26 }
 0x236   :  { %1259 = vmatprep.mubr.bf16.mxu1 %v907_v18  ;;  %v906_v20 = vpack.c.bf16 %v898_v19, %v898_v19  ;;  %2607 = vmatprep.subr.bf16.mxu1 %v2822_v27  ;;  %v2937_v18 = vmov 1983009808  }
 0x237   :  { %v1344_v19 = vunpack.c.l.s4 %v2937_v18 }
 0x238   :  { %1260 = vmatmul.mubr.bf16.gmra.mrb[12].mxu1 %v906_v20  ;;  %v1346_v20 = vlaneseq }
 0x239   :  { %2608 = vmatpush3.bf16.msra.mxu1 %v2823_v28  ;;  %v1345_v23 = vunpack.c.0.s8 %v1344_v19 }
 0x23a   :  { %2609 = vmatprep.subr.bf16.mxu1 %v2824_v50  ;;  %v3496_v24 = vshrl.u32 %v1346_v20, 7  ;;  %v2849_v50 = vld [vmem:[%s3735_s5 + $0x100] sm:$0xff]  }
 0x23c   :  { %v1348_v25 = vsub.s32 %v1345_v23, %v3496_v24  ;;  %v2456_v23 = vld [vmem:[%s3736_s6] ss:$0 sm:$0xff] }
 0x23d   :  { %2610 = vmatpush3.bf16.msra.mxu1 %v2825_v51 }
 0x23e   :  { %2611 = vmatprep.subr.bf16.mxu1 %v2826_v56  ;;  %v2852_v56 = vld [vmem:[%s3735_s5 + $0x118] sm:$0xff]  }
 0x241   :  { %2612 = vmatpush3.bf16.msra.mxu1 %v2827_v57 }
 0x242   :  { %2613 = vmatprep.subr.bf16.mxu1 %v2828_v58 }
 0x245   :  { %2614 = vmatpush3.bf16.msra.mxu1 %v2829_v59  ;;  %v2853_v59 = vld [vmem:[%s3737_s7] ss:$16 sps:$4 sm:$0xff]  }
 0x246   :  { %2615 = vmatprep.subr.bf16.mxu1 %v2830_v61  ;;  %v2858_v61 = vld [vmem:[%s3737_s7 + $0x24] ss:$16 sps:$4 sm:$0xff]  }
 0x249   :  { %2616 = vmatpush3.bf16.msra.mxu1 %v2831_v5  ;;  %v2877_v5 = vld [vmem:[%s3739_s9 + $0x40] sm:$0xff]  }
 0x24a   :  { %2623 = vmatprep.subr.bf16.mxu1 %v2832_v14  ;;  %2650 = vmatprep.subr.bf16.mxu0 %v2877_v5  ;;  %v2887_v14 = vld [vmem:[%s3739_s9 + $0x68] sm:$0xff]  }
 0x2b4   :  { %v2561_v29 = vpop.f32.mrb[0].mxu1 }
 0x2b5   :  { %v2562_v30 = vpop.f32.mrb[1].mxu1 }
 0x2b6   :  { %v2563_v31 = vadd.f32 %v2562_v30, %v2561_v29  ;;  %v2564_v32 = vpop.f32.mrb[2].mxu1 }
 0x2b7   :  { %v2565_v33 = vpop.f32.mrb[3].mxu1 }
 0x2b8   :  { %v2566_v34 = vadd.f32 %v2565_v33, %v2564_v32  ;;  %v1206_v43 = vadd.f32 %v2563_v31, %v2418_v40  ;;  %v2833_v32 = vld [vmem:[%s3735_s5 + $0x80] sm:$0xff]  }
 0x2ba   :  { %v1209_v47 = vadd.f32 %v2566_v34, %v2418_v40 }
 0x2bc   :  { %v2567_v35 = vpop.f32.mrb[4].mxu1 }
 0x2bd   :  { %v2568_v36 = vpop.f32.mrb[5].mxu1 }
 0x2be   :  { %v2569_v37 = vadd.f32 %v2568_v36, %v2567_v35  ;;  %v2570_v38 = vpop.f32.mrb[6].mxu1  ;;  %v2835_v35 = vld [vmem:[%s3735_s5 + $0xc8] sm:$0xff]  }
 0x2bf   :  { %v2571_v39 = vpop.f32.mrb[7].mxu1  ;;  %v2837_v38 = vld [vmem:[%s3735_s5 + $0xd0] sm:$0xff]  }
 0x2c0   :  { %v1214_v63 = vadd.f32 %v2569_v37, %v2418_v40  ;;  %v2836_v37 = vld [vmem:[%s3735_s5 + $0x88] sm:$0xff]   ;;  %v2838_v39 = vld [vmem:[%s3735_s5 + $0x90] sm:$0xff]   ;;  %v2839_v40 = vld [vmem:[%s3735_s5 + $0xd8] sm:$0xff]  }
 0x2ff   :  { %v2589_v41 = vpop.f32.mrb[8].mxu1 }
 0x300   :  { %v2590_v42 = vpop.f32.mrb[9].mxu1 }
 0x301   :  { %v2591_v44 = vadd.f32 %v2590_v42, %v2589_v41  ;;  %v2592_v45 = vpop.f32.mrb[10].mxu1  ;;  %v2840_v41 = vld [vmem:[%s3735_s5 + $0x98] sm:$0xff]   ;;  %v2841_v42 = vld [vmem:[%s3735_s5 + $0xe0] sm:$0xff]  }
 0x302   :  { %v2593_v46 = vpop.f32.mrb[11].mxu1 }
 0x303   :  { %v1254_v48 = vadd.f32 %v2591_v44, %v1206_v43  ;;  %v2594_v49 = vadd.f32 %v2593_v46, %v2592_v45  ;;  %v2842_v43 = vld [vmem:[%s3735_s5 + $0xa0] sm:$0xff]   ;;  %v2843_v44 = vld [vmem:[%s3735_s5 + $0xe8] sm:$0xff]   ;;  %v2845_v46 = vld [vmem:[%s3735_s5 + $0xf0] sm:$0xff]  }
 0x304   :  { %v2844_v45 = vld [vmem:[%s3735_s5 + $0xa8] sm:$0xff]  }
 0x305   :  { %v1267_v52 = vmax.f32 %v1254_v48, 0.0  ;;  %v1257_v54 = vadd.f32 %v2594_v49, %v1209_v47  ;;  %v2846_v47 = vld [vmem:[%s3735_s5 + $0xb0] sm:$0xff]   ;;  %v2847_v48 = vld [vmem:[%s3735_s5 + $0xf8] sm:$0xff]  }
 0x306   :  { %v2848_v49 = vld [vmem:[%s3735_s5 + $0xb8] sm:$0xff]  }
 0x307   :  { %1271 = vst.msk [vmem:[#allocation4] sm:$0xff] %vm1270_vm8, %v1267_v52  ;;  %v1268_v55 = vmax.f32 %v1257_v54, 0.0  ;;  %v2938_v52 = vmov 0.0   ;;  %v2850_v54 = vld [vmem:[%s3735_s5 + $0x108] sm:$0xff]  }
 0x309   :  { %1272 = vst.msk [vmem:[#allocation4 + $0x8] sm:$0xff] %vm1270_vm8, %v1268_v55  ;;  %v2851_v55 = vld [vmem:[%s3735_s5 + $0x110] sm:$0xff]  }
 0x30b   :  { %v2595_v60 = vpop.f32.mrb[12].mxu1 }
 0x30c   :  { %v2596_v62 = vpop.f32.mrb[13].mxu1 }
 0x30d   :  { %v2597_v0 = vadd.f32 %v2596_v62, %v2595_v60  ;;  %v2598_v2 = vpop.f32.mrb[14].mxu1  ;;  %v2855_v60 = vld [vmem:[%s3737_s7 + $0x4] ss:$16 sps:$4 sm:$0xff]   ;;  %v2856_v62 = vld [vmem:[%s3737_s7 + $0x20] ss:$16 sps:$4 sm:$0xff]  }
 0x30e   :  { %v2599_v3 = vpop.f32.mrb[15].mxu1  ;;  %v2452_v4 = vld.sshfl [vmem:[#allocation4 + $0x6] sm:$0x3 pattern:$0x76325410] }
 0x30f   :  { %v1262_v6 = vadd.f32 %v2597_v0, %v1214_v63  ;;  %1302 = vrot.lane.b32.xlu1 %v2452_v4, %s2935_s2  ;;  %v2451_v53 = vld.sshfl [vmem:[#allocation4 + $0x2] sm:$0x3 pattern:$0x76325410]  ;;  %v1291_v7 = vld [vmem:[#allocation4 + $0x4] sm:$0x3] }
 0x310   :  { %1286 = vrot.lane.b32.xlu0 %v2451_v53, %s2935_s2  ;;  %1292 = vst.msk [vmem:[#allocation5 + $0x2] sm:$0x3] %vm1273_vm9, %v1291_v7  ;;  %v1275_v8 = vld [vmem:[#allocation4] sm:$0x3]  ;;  %v1321_v11 = vld [vmem:[#allocation4 + $0xc] sm:$0x3] }
 0x311   :  { %v1269_v9 = vmax.f32 %v1262_v6, 0.0  ;;  %v2454_v10 = vld.sshfl [vmem:[#allocation4 + $0xe] sm:$0x3 pattern:$0x76325410]  ;;  %v2878_v6 = vld [vmem:[%s3739_s9] sm:$0xff]  }
 0x312   :  { %1276 = vst.msk [vmem:[#allocation5] sm:$0x3] %vm1273_vm9, %v1275_v8  ;;  %v1306_v12 = vld [vmem:[#allocation4 + $0x8] sm:$0x3]  ;;  %1322 = vst.msk [vmem:[#allocation5 + $0x6] sm:$0x3] %vm1273_vm9, %v1321_v11  ;;  %2651 = vmatpush3.bf16.msra.mxu0 %v2878_v6 }
 0x313   :  { %1274 = vst.msk [vmem:[#allocation4 + $0x10] sm:$0x3] %vm1273_vm9, %v1269_v9  ;;  %1332 = vrot.lane.b32.xlu1 %v2454_v10, %s2935_s2  ;;  %v2453_v13 = vld.sshfl [vmem:[#allocation4 + $0xa] sm:$0x3 pattern:$0x76325410] }
 0x314   :  { %1307 = vst.msk [vmem:[#allocation5 + $0x4] sm:$0x3] %vm1273_vm9, %v1306_v12  ;;  %1317 = vrot.lane.b32.xlu0 %v2453_v13, %s2935_s2  ;;  %v2861_v63 = vld [vmem:[%s3737_s7 + $0x44] ss:$16 sps:$4 sm:$0xff]   ;;  %v2859_v0 = vld [vmem:[%s3737_s7 + $0x40] ss:$16 sps:$4 sm:$0xff]  }
 0x315   :  { %v2864_v2 = vld [vmem:[%s3737_s7 + $0x64] ss:$16 sps:$4 sm:$0xff]   ;;  %v2862_v3 = vld [vmem:[%s3737_s7 + $0x60] ss:$16 sps:$4 sm:$0xff]   ;;  %v2867_v4 = vld [vmem:[%s3737_s7 + $0xc] ss:$16 sps:$4 sm:$0xff]  }
 0x316   :  { %v2879_v53 = vld [vmem:[%s3739_s9 + $0x48] sm:$0xff]   ;;  %v2881_v8 = vld [vmem:[%s3739_s9 + $0x50] sm:$0xff]   ;;  %v2883_v10 = vld [vmem:[%s3739_s9 + $0x58] sm:$0xff]  }
 0x317   :  { %v2880_v7 = vld [vmem:[%s3739_s9 + $0x8] sm:$0xff]   ;;  %2652 = vmatprep.subr.bf16.mxu0 %v2879_v53  ;;  %v2882_v9 = vld [vmem:[%s3739_s9 + $0x10] sm:$0xff]   ;;  %v2884_v11 = vld [vmem:[%s3739_s9 + $0x18] sm:$0xff]  }
 0x318   :  { %2653 = vmatpush3.bf16.msra.mxu0 %v2880_v7  ;;  %v2885_v12 = vld [vmem:[%s3739_s9 + $0x60] sm:$0xff]  }
 0x319   :  { %2654 = vmatprep.subr.bf16.mxu0 %v2881_v8  ;;  %v2886_v13 = vld [vmem:[%s3739_s9 + $0x20] sm:$0xff]  }
 0x31a   :  { %v1336_v15 = vld [vmem:[#allocation4 + $0x10] sm:$0x3] }
 0x31b   :  { %1337 = vst.msk [vmem:[#allocation5 + $0x8] sm:$0x3] %vm1273_vm9, %v1336_v15  ;;  %v2888_v15 = vld [vmem:[%s3739_s9 + $0x28] sm:$0xff]  }
 0x31c   :  { %2655 = vmatpush3.bf16.msra.mxu0 %v2882_v9 }
 0x31d   :  { %2656 = vmatprep.subr.bf16.mxu0 %v2883_v10 }
 0x320   :  { %2657 = vmatpush3.bf16.msra.mxu0 %v2884_v11 }
 0x321   :  { %2658 = vmatprep.subr.bf16.mxu0 %v2885_v12 }
 0x322   :  { %v2455_v57 = vld.sshfl [vmem:[#allocation5 + $0x8] sm:$0x3 pattern:$0x76325410] }
 0x323   :  { %v1375_v58 = vpack.c.bf16 %v2455_v57, %v2455_v57  ;;  %v2902_v57 = vld [vmem:[%s3739_s9 + $0xa0] sm:$0xff]  }
 0x324   :  { %2659 = vmatpush3.bf16.msra.mxu0 %v2886_v13 }
 0x325   :  { %2660 = vmatprep.subr.bf16.mxu0 %v2887_v14 }
 0x328   :  { %2661 = vmatpush3.bf16.msra.mxu0 %v2888_v15  ;;  %v1824_v15 = vsub.s32 2, %v3496_v24 }
 0x381   :  { %v1303_v16 = vpop.permute.xlu1 %1302 }
 0x382   :  { %1305 = vst.msk [vmem:[#allocation5 + $0x2] sm:$0x3] %vm1289_vm10, %v1303_v16  ;;  %v1287_v17 = vpop.permute.xlu0 %1286  ;;  %v2889_v16 = vld [vmem:[%s3739_s9 + $0x70] sm:$0xff]  }
 0x383   :  { %1290 = vst.msk [vmem:[#allocation5] sm:$0x3] %vm1289_vm10, %v1287_v17  ;;  %v2890_v17 = vld [vmem:[%s3739_s9 + $0x30] sm:$0xff]   ;;  %2662 = vmatprep.subr.bf16.mxu0 %v2889_v16  ;;  %v1828_v16 = vsub.s32 3, %v3496_v24 }
 0x384   :  { %2663 = vmatpush3.bf16.msra.mxu0 %v2890_v17 }
 0x385   :  { %v1333_v21 = vpop.permute.xlu1 %1332 }
 0x386   :  { %1335 = vst.msk [vmem:[#allocation5 + $0x6] sm:$0x3] %vm1289_vm10, %v1333_v21  ;;  %v1318_v22 = vpop.permute.xlu0 %1317 }
 0x387   :  { %1320 = vst.msk [vmem:[#allocation5 + $0x4] sm:$0x3] %vm1289_vm10, %v1318_v22 }
 0x38e   :  { %v1338_v26 = vld [vmem:[#allocation5] sm:$0xff] }
 0x38f   :  { %v1349_v27 = vrot.slane %v1338_v26, %v1348_v25  ;;  %v1342_v28 = vcombine.high %v1338_v26, %v1338_v26 }
 0x391   :  { %v1357_v29 = vcombine.high %v1349_v27, %v1349_v27  ;;  %v1356_v30 = vrot.slane %v1342_v28, %v1348_v25  ;;  %v1371_v34 = vpack.c.bf16 %v1349_v27, %v1349_v27 }
 0x393   :  { %v1372_v31 = vpack.c.bf16 %v1357_v29, %v1357_v29  ;;  %v1358_v33 = vcombine.high %v1356_v30, %v1356_v30  ;;  %v1373_v51 = vpack.c.bf16 %v1356_v30, %v1356_v30 }
 0x395   :  { %1706 = vmatprep.mubr.bf16.mxu1 %v1372_v31  ;;  %v1374_v36 = vpack.c.bf16 %v1358_v33, %v1358_v33 }
 0x396   :  { %1707 = vmatmul.mubr.bf16.vlgmr.msra.gmra.mrb[16].mxu1 %v1371_v34 }
 0x397   :  { %2624 = vmatpush3.bf16.msra.mxu1 %v2833_v32  ;;  %1746 = vmatprep.mubr.bf16.mxu1 %v1374_v36 }
 0x398   :  { %2625 = vmatprep.subr.bf16.mxu1 %v2835_v35 }
 0x39b   :  { %2626 = vmatpush3.bf16.msra.mxu1 %v2836_v37 }
 0x39c   :  { %2627 = vmatprep.subr.bf16.mxu1 %v2837_v38  ;;  %v2865_v38 = vld [vmem:[%s3737_s7 + $0x8] ss:$16 sps:$4 sm:$0xff]  }
 0x39f   :  { %2628 = vmatpush3.bf16.msra.mxu1 %v2838_v39 }
 0x3a0   :  { %2629 = vmatprep.subr.bf16.mxu1 %v2839_v40  ;;  %v2870_v40 = vld [vmem:[%s3737_s7 + $0x2c] ss:$16 sps:$4 sm:$0xff]  }
 0x3a3   :  { %2630 = vmatpush3.bf16.msra.mxu1 %v2840_v41  ;;  %v2868_v41 = vld [vmem:[%s3737_s7 + $0x28] ss:$16 sps:$4 sm:$0xff]  }
 0x3a4   :  { %2631 = vmatprep.subr.bf16.mxu1 %v2841_v42  ;;  %v2873_v42 = vld [vmem:[%s3737_s7 + $0x4c] ss:$16 sps:$4 sm:$0xff]  }
 0x3a7   :  { %2632 = vmatpush3.bf16.msra.mxu1 %v2842_v43  ;;  %v2871_v43 = vld [vmem:[%s3737_s7 + $0x48] ss:$16 sps:$4 sm:$0xff]  }
 0x3a8   :  { %2633 = vmatprep.subr.bf16.mxu1 %v2843_v44  ;;  %v2876_v44 = vld [vmem:[%s3737_s7 + $0x6c] ss:$16 sps:$4 sm:$0xff]  }
 0x3ab   :  { %2634 = vmatpush3.bf16.msra.mxu1 %v2844_v45  ;;  %v2891_v45 = vld [vmem:[%s3739_s9 + $0xc0] sm:$0xff]  }
 0x3ac   :  { %2635 = vmatprep.subr.bf16.mxu1 %v2845_v46  ;;  %v2892_v46 = vld [vmem:[%s3739_s9 + $0x80] sm:$0xff]  }
 0x3af   :  { %2636 = vmatpush3.bf16.msra.mxu1 %v2846_v47  ;;  %v2893_v47 = vld [vmem:[%s3739_s9 + $0xc8] sm:$0xff]  }
 0x3b0   :  { %2637 = vmatprep.subr.bf16.mxu1 %v2847_v48  ;;  %v2894_v48 = vld [vmem:[%s3739_s9 + $0x88] sm:$0xff]  }
 0x3b3   :  { %2638 = vmatpush3.bf16.msra.mxu1 %v2848_v49  ;;  %v2895_v49 = vld [vmem:[%s3739_s9 + $0xd0] sm:$0xff]  }
 0x3b4   :  { %2694 = vmatprep.subr.bf16.mxu1 %v2938_v52 }
 0x3b6   :  { %1747 = vmatmul.mubr.bf16.vlgmr.msra.gmra.mrb[20].mxu1 %v1373_v51  ;;  %v2899_v51 = vld [vmem:[%s3739_s9 + $0xd8] sm:$0xff]  }
 0x3b7   :  { %2695 = vmatpush3.bf16.msra.mxu1 %v2849_v50  ;;  %2702 = vmatprep.mubr.msk.bf16.mxu1 %vm2939_vm11, %v2938_v52  ;;  %v2896_v50 = vld [vmem:[%s3739_s9 + $0x90] sm:$0xff]  }
 0x3b8   :  { %2696 = vmatprep.subr.bf16.mxu1 %v2938_v52 }
 0x3bb   :  { %2697 = vmatpush3.bf16.msra.mxu1 %v2850_v54  ;;  %v2900_v54 = vld [vmem:[%s3739_s9 + $0x98] sm:$0xff]  }
 0x3bc   :  { %2698 = vmatprep.subr.bf16.mxu1 %v2938_v52 }
 0x3bf   :  { %2699 = vmatpush3.bf16.msra.mxu1 %v2851_v55  ;;  %v2898_v55 = vld [vmem:[%s3739_s9 + $0x38] sm:$0xff]  }
 0x3c0   :  { %2700 = vmatprep.subr.bf16.mxu1 %v2938_v52  ;;  %v2897_v52 = vld [vmem:[%s3739_s9 + $0x78] sm:$0xff]  }
 0x3c1   :  { %2664 = vmatprep.subr.bf16.mxu0 %v2897_v52 }
 0x3c2   :  { %2665 = vmatpush3.bf16.msra.mxu0 %v2898_v55 }
 0x3c3   :  { %2701 = vmatpush3.bf16.msra.mxu1 %v2852_v56  ;;  %v2901_v56 = vld [vmem:[%s3739_s9 + $0xe0] sm:$0xff]  }
 0x3c4   :  { %1917 = vmatprep.subr.bf16.mxu1 %v2855_v60  ;;  %v2905_v60 = vld [vmem:[%s3739_s9 + $0xf0] sm:$0xff]  }
 0x3c6   :  { %2703 = vmatmul.mubr.msk.bf16.vlgmr.msra.gmra.mrb[24].mxu1 %vm1270_vm8, %v1375_v58  ;;  %v2903_v58 = vld [vmem:[%s3739_s9 + $0xe8] sm:$0xff]  }
 0x3c7   :  { %1949 = vmatprep.mubr.bf16.mxu1 %v2933_v1  ;;  %1918 = vmatpush1.bf16.msra.mxu1 %v2853_v59  ;;  %v2904_v59 = vld [vmem:[%s3739_s9 + $0xa8] sm:$0xff]  }
 0x3c8   :  { %1919 = vmatprep.subr.bf16.mxu1 %v2858_v61  ;;  %v2906_v61 = vld [vmem:[%s3739_s9 + $0xb0] sm:$0xff]  }
 0x3cb   :  { %1920 = vmatpush1.bf16.msra.mxu1 %v2856_v62  ;;  %v2907_v62 = vld [vmem:[%s3739_s9 + $0xf8] sm:$0xff]  }
 0x3cc   :  { %1921 = vmatprep.subr.bf16.mxu1 %v2861_v63  ;;  %v2908_v63 = vld [vmem:[%s3739_s9 + $0xb8] sm:$0xff]  }
 0x3cf   :  { %1922 = vmatpush1.bf16.msra.mxu1 %v2859_v0  ;;  %v1816_v0 = vsub.s32 0, %v3496_v24 }
 0x3d0   :  { %1923 = vmatprep.subr.bf16.mxu1 %v2864_v2  ;;  %v1812_v2 = vld [vmem:[%s3738_s8] sm:$0xf] }
 0x3d1   :  { %v1825_v17 = vrot.slane %v1812_v2, %v1824_v15 }
 0x3d3   :  { %1924 = vmatpush1.bf16.msra.mxu1 %v2862_v3  ;;  %v1820_v3 = vsub.s32 1, %v3496_v24  ;;  %v2512_v24 = vld [vmem:[%s3740_s10] ss:$0 sm:$0xff] }
 0x3d4   :  { %1958 = vmatprep.subr.bf16.mxu1 %v2867_v4  ;;  %v1817_v4 = vrot.slane %v1812_v2, %v1816_v0 }
 0x3d5   :  { %v1821_v5 = vrot.slane %v1812_v2, %v1820_v3 }
 0x469   :  { %v2617_v18 = vpop.f32.mrb[16].mxu1 }
 0x46a   :  { %v2618_v19 = vpop.f32.mrb[17].mxu1 }
 0x46b   :  { %v2619_v20 = vadd.f32 %v2618_v19, %v2617_v18  ;;  %v2620_v21 = vpop.f32.mrb[18].mxu1  ;;  %v1829_v18 = vrot.slane %v1812_v2, %v1828_v16 }
 0x46c   :  { %v2621_v22 = vpop.f32.mrb[19].mxu1 }
 0x46d   :  { %v1709_v27 = vadd.f32 %v2619_v20, %v2456_v23 }
 0x489   :  { %v2639_v25 = vpop.f32.mrb[20].mxu1 }
 0x48a   :  { %v2640_v26 = vpop.f32.mrb[21].mxu1 }
 0x48b   :  { %v2641_v28 = vadd.f32 %v2640_v26, %v2639_v25  ;;  %v2642_v29 = vpop.f32.mrb[22].mxu1 }
 0x48c   :  { %v2643_v30 = vpop.f32.mrb[23].mxu1 }
 0x48d   :  { %v1749_v31 = vadd.f32 %v2641_v28, %v1709_v27 }
 0x499   :  { %v1788_v32 = vpop.f32.mrb[24].mxu1 }
 0x49a   :  { %v1789_v33 = vadd.f32 %v1788_v32, %v1749_v31  ;;  %v2704_v34 = vpop.f32.mrb[25].mxu1 }
 0x49b   :  { %v1791_v35 = vpop.f32.mrb[26].mxu1 }
 0x49c   :  { %v1794_v36 = vmax.f32 %v1789_v33, 0.0  ;;  %v2705_v37 = vpop.f32.mrb[27].mxu1 }
 0x49e   :  { %v1795_v39 = vpack.c.bf16 %v1794_v36, %v1794_v36 }
 0x4a0   :  { %2510 = vmatmul.mubr.msk.bf16.vlgmr.msra.gmra.mrb[28].mxu1 %vm1270_vm8, %v1795_v39 }
 0x4a1   :  { %1959 = vmatpush1.bf16.msra.mxu1 %v2865_v38  ;;  %1990 = vmatprep.mubr.bf16.mxu1 %v2933_v1  ;;  %v2874_v1 = vld [vmem:[%s3737_s7 + $0x68] ss:$16 sps:$4 sm:$0xff]  }
 0x4a2   :  { %1960 = vmatprep.subr.bf16.mxu1 %v2870_v40 }
 0x4a5   :  { %1961 = vmatpush1.bf16.msra.mxu1 %v2868_v41 }
 0x4a6   :  { %1962 = vmatprep.subr.bf16.mxu1 %v2873_v42 }
 0x4a9   :  { %1963 = vmatpush1.bf16.msra.mxu1 %v2871_v43 }
 0x4aa   :  { %1964 = vmatprep.subr.bf16.mxu1 %v2876_v44 }
 0x4ad   :  { %1965 = vmatpush1.bf16.msra.mxu1 %v2874_v1 }
 0x4ae   :  { %2672 = vmatprep.subr.bf16.mxu1 %v2891_v45 }
 0x4b0   :  { %2511 = vmatmul.mubr.msk.bf16.vlgmr.msra.gmra.mrb[32].mxu1 %vm1270_vm8, %v1795_v39 }
 0x4b1   :  { %2673 = vmatpush3.bf16.msra.mxu1 %v2892_v46 }
 0x4b2   :  { %2674 = vmatprep.subr.bf16.mxu1 %v2893_v47 }
 0x4b5   :  { %2675 = vmatpush3.bf16.msra.mxu1 %v2894_v48 }
 0x4b6   :  { %2676 = vmatprep.subr.bf16.mxu1 %v2895_v49 }
 0x4b9   :  { %2677 = vmatpush3.bf16.msra.mxu1 %v2896_v50 }
 0x4ba   :  { %2678 = vmatprep.subr.bf16.mxu1 %v2899_v51 }
 0x4bd   :  { %2679 = vmatpush3.bf16.msra.mxu1 %v2900_v54 }
 0x4be   :  { %2680 = vmatprep.subr.bf16.mxu1 %v2901_v56 }
 0x4c1   :  { %2681 = vmatpush3.bf16.msra.mxu1 %v2902_v57 }
 0x4c2   :  { %2682 = vmatprep.subr.bf16.mxu1 %v2903_v58 }
 0x4c5   :  { %2683 = vmatpush3.bf16.msra.mxu1 %v2904_v59 }
 0x4c6   :  { %2684 = vmatprep.subr.bf16.mxu1 %v2905_v60 }
 0x4c9   :  { %2685 = vmatpush3.bf16.msra.mxu1 %v2906_v61 }
 0x4ca   :  { %2686 = vmatprep.subr.bf16.mxu1 %v2907_v62 }
 0x4cd   :  { %2687 = vmatpush3.bf16.msra.mxu1 %v2908_v63 }
 0x573   :  { %v1951_v6 = vpop.f32.mrb[28].mxu1 }
 0x574   :  { %v1952_v53 = vadd.f32 %v1951_v6, %v1817_v4  ;;  %v1953_v7 = vpop.f32.mrb[29].mxu1 }
 0x575   :  { %v1954_v8 = vadd.f32 %v1953_v7, %v1821_v5  ;;  %v1955_v9 = vpop.f32.mrb[30].mxu1 }
 0x576   :  { %v1999_v10 = vmax.f32 %v1952_v53, 0.0  ;;  %v1956_v11 = vpop.f32.mrb[31].mxu1 }
 0x577   :  { %v2000_v12 = vmax.f32 %v1954_v8, 0.0 }
 0x578   :  { %v2003_v14 = vpack.c.bf16 %v1999_v10, %v1999_v10 }
 0x579   :  { %v2004_v13 = vpack.c.bf16 %v2000_v12, %v2000_v12 }
 0x57b   :  { %2302 = vmatprep.mubr.bf16.mxu0 %v2004_v13 }
 0x57c   :  { %2303 = vmatmul.mubr.bf16.vlgmr.msra.gmra.mrb[72].mxu0 %v2003_v14 }
 0x583   :  { %v1992_v19 = vpop.f32.mrb[32].mxu1 }
 0x584   :  { %v1993_v20 = vadd.f32 %v1992_v19, %v1825_v17  ;;  %v1994_v21 = vpop.f32.mrb[33].mxu1 }
 0x585   :  { %v1995_v22 = vadd.f32 %v1994_v21, %v1829_v18  ;;  %v1996_v23 = vpop.f32.mrb[34].mxu1 }
 0x586   :  { %v2001_v25 = vmax.f32 %v1993_v20, 0.0  ;;  %v1997_v26 = vpop.f32.mrb[35].mxu1 }
 0x587   :  { %v2002_v27 = vmax.f32 %v1995_v22, 0.0 }
 0x588   :  { %v2005_v29 = vpack.c.bf16 %v2001_v25, %v2001_v25 }
 0x589   :  { %v2006_v28 = vpack.c.bf16 %v2002_v27, %v2002_v27 }
 0x58b   :  { %2342 = vmatprep.mubr.bf16.mxu1 %v2006_v28 }
 0x58c   :  { %2343 = vmatmul.mubr.bf16.vlgmr.msra.gmra.mrb[36].mxu1 %v2005_v29 }
 0x64f   :  { %v2666_v30 = vpop.f32.mrb[72].mxu0 }
 0x650   :  { %v2667_v31 = vpop.f32.mrb[73].mxu0 }
 0x651   :  { %v2668_v32 = vadd.f32 %v2667_v31, %v2666_v30  ;;  %v2669_v33 = vpop.f32.mrb[74].mxu0 }
 0x652   :  { %v2670_v34 = vpop.f32.mrb[75].mxu0 }
 0x653   :  { %v2305_v37 = vadd.f32 %v2668_v32, %v2512_v24 }
 0x65f   :  { %v2688_v35 = vpop.f32.mrb[36].mxu1 }
 0x660   :  { %v2689_v36 = vpop.f32.mrb[37].mxu1 }
 0x661   :  { %v2690_v38 = vadd.f32 %v2689_v36, %v2688_v35  ;;  %v2691_v39 = vpop.f32.mrb[38].mxu1 }
 0x662   :  { %v2692_v40 = vpop.f32.mrb[39].mxu1 }
 0x663   :  { %v2345_v41 = vadd.f32 %v2690_v38, %v2305_v37 }
 0x665   :  { %2350 = vst [vmem:[#allocation6] sm:$0x3] %v2345_v41 }
 0x666   :  { %2920 = shalt.err (!%p2917_p4)
}
 0x667   :  { %s2921_s30 = scalar_lea.hbm %s3741_s11, 32 }
 0x668   :  { %p2922_p5 = scmp.ne.s32.totalorder %s3741_s11, %s2921_s30  ;;  %p2925_p6 = scmp.lt.u32.totalorder %s2921_s30, %s3741_s11 }
 0x66a   :  { %p2927_p7 = pnand %p2925_p6, %p2922_p5 }
 0x66c   :  { %2930 = shalt.err (!%p2927_p7)
}
 0x66d   :  { %2360 = dma.vmem_to_hbm [thread:$0]  %s2358_s3, 32, %s3741_s11, [#allocation7]  }
 0x66e   :  { %2931 = dma.done.wait [#allocation7], 32  }
 0x66f   :  { %2932 = vsyncadd [#allocation7], 4294967264 }
 0x670   :  { %2364 = vsyncpa [#allocation7], 1 }

</bundles_post_ra>
